<compile_context>
chip_gen: v6e
topology: v6e:2x2x1
jax: 0.10.0
libtpu: 0.0.40
codegen_flags: <defaults>
</compile_context>

<pallas_src>
import jax
import jax.numpy as jnp
from jax import lax
from jax.experimental import pallas as pl
from jax.experimental.pallas import tpu as pltpu

MAXF = 15          # maxFaces
GFEAT = 2208       # DenseNet161 feature channels
GH, GW = 7, 7      # DenseNet161 spatial map
DG = 256           # global_fc_main / face-feature width
DA = 64            # attentionfc1 width
NCLASS = 3         # global_fc3_debug outputs
NPAD = 128         # lane-dense padding of the class dim
BN_EPS = 1e-5


# ---------------------------------------------------------------------------
# K1: global branch  — ReLU -> global avg-pool -> global_fc_main
# ---------------------------------------------------------------------------
def _global_head_kernel(feat_ref, w_ref, b_ref, o_ref):
    # feat_ref: (1, 49, 2208) f32 — one image, spatial-major, channels on lanes.
    x = jnp.maximum(feat_ref[0], 0.0)                       # ReLU
    pooled = jnp.mean(x, axis=0, keepdims=True)             # avg_pool2d(k=7) -> (1, 2208)
    y = jnp.dot(pooled.astype(jnp.bfloat16), w_ref[...],
                preferred_element_type=jnp.float32) + b_ref[...]
    o_ref[...] = y.reshape(1, 1, DG)


def _global_head(feat, w, b):
    B = feat.shape[0]
    return pl.pallas_call(
        _global_head_kernel,
        out_shape=jax.ShapeDtypeStruct((B, 1, DG), jnp.float32),
        grid_spec=pltpu.PrefetchScalarGridSpec(
            num_scalar_prefetch=0,
            grid=(B,),
            in_specs=[
                pl.BlockSpec((1, GH * GW, GFEAT), lambda i: (i, 0, 0)),
                pl.BlockSpec((GFEAT, DG), lambda i: (0, 0)),
                pl.BlockSpec((1, DG), lambda i: (0, 0)),
            ],
            out_specs=pl.BlockSpec((1, 1, DG), lambda i: (i, 0, 0)),
        ),
        compiler_params=pltpu.CompilerParams(
            dimension_semantics=("parallel",)),
    )(feat, w, b)


# ---------------------------------------------------------------------------
# K2: face branch — fc1 -> fc2 -> mask -> softmax -> weighted sum of faces
# ---------------------------------------------------------------------------
def _face_attention_kernel(nf_ref, face_ref, w1_ref, b1_ref, w2_ref, b2_ref, o_ref):
    b = pl.program_id(0)
    nf = nf_ref[b]                                          # numberFaces[b] (SMEM scalar)
    x = face_ref[0]                                         # (15, 256) f32
    h = jnp.dot(x.astype(jnp.bfloat16), w1_ref[...],
                preferred_element_type=jnp.float32) + b1_ref[...]        # (15, 64)
    # attentionfc2 (64 -> 1) as a lane reduction (avoids an N=1 MXU matmul / store).
    s = jnp.sum(h * w2_ref[...], axis=1, keepdims=True) + b2_ref[...]    # (15, 1)
    # mask entries >= numberFaces with -inf (matches the numpy mask in the module)
    idx = lax.broadcasted_iota(jnp.int32, (MAXF, 1), 0)
    neg_inf = jnp.float32(-jnp.inf)
    s = jnp.where(idx >= nf, neg_inf, s)
    # masked softmax; all-masked (numberFaces == 0) collapses to all-zero weights,
    # reproducing the "maxNumber == 0 -> attention_weights = 0" branch.
    m = jnp.max(s, axis=0, keepdims=True)
    m_safe = jnp.where(m > neg_inf, m, jnp.zeros_like(m))
    e = jnp.exp(s - m_safe)
    denom = jnp.sum(e, axis=0, keepdims=True)
    inv = jnp.where(denom > 0.0, 1.0 / denom, jnp.zeros_like(denom))
    attn = e * inv                                          # (15, 1)
    attended = jnp.sum(attn * x, axis=0, keepdims=True)     # bmm(attn, faces) -> (1, 256)
    o_ref[...] = attended.reshape(1, 1, DG)


def _face_attention(number_faces, face_features, w1, b1, w2, b2):
    B = face_features.shape[0]
    return pl.pallas_call(
        _face_attention_kernel,
        out_shape=jax.ShapeDtypeStruct((B, 1, DG), jnp.float32),
        grid_spec=pltpu.PrefetchScalarGridSpec(
            num_scalar_prefetch=1,
            grid=(B,),
            in_specs=[
                pl.BlockSpec((1, MAXF, DG), lambda i, nf: (i, 0, 0)),
                pl.BlockSpec((DG, DA), lambda i, nf: (0, 0)),
                pl.BlockSpec((1, DA), lambda i, nf: (0, 0)),
                pl.BlockSpec((1, DA), lambda i, nf: (0, 0)),
                pl.BlockSpec((1, 1), lambda i, nf: (0, 0)),
            ],
            out_specs=pl.BlockSpec((1, 1, DG), lambda i, nf: (i, 0, 0)),
        ),
        compiler_params=pltpu.CompilerParams(
            dimension_semantics=("parallel",)),
    )(number_faces, face_features, w1, b1, w2, b2)


# ---------------------------------------------------------------------------
# K3: BatchNorm1d(affine=False) x2 -> concat -> global_fc3_debug (lane-padded)
# ---------------------------------------------------------------------------
def _bn_concat_fc3_kernel(face_ref, glob_ref, wf_ref, wg_ref, b_ref, o_ref):
    def bn(v):   # nn.BatchNorm1d(affine=False): batch mean / biased variance
        mu = jnp.mean(v, axis=0, keepdims=True)
        var = jnp.mean(jnp.square(v - mu), axis=0, keepdims=True)
        return (v - mu) * lax.rsqrt(var + BN_EPS)

    f = bn(face_ref[...])                                   # (B, 256)
    g = bn(glob_ref[...])                                   # (B, 256)
    # cat([f, g], dim=1) @ W3  ==  f @ W3[:256] + g @ W3[256:]
    y = (jnp.dot(f.astype(jnp.bfloat16), wf_ref[...], preferred_element_type=jnp.float32)
         + jnp.dot(g.astype(jnp.bfloat16), wg_ref[...], preferred_element_type=jnp.float32)
         + b_ref[...])
    o_ref[...] = y                                          # (B, 128) lane-dense


def _bn_concat_fc3(face_feats, glob_feats, wf, wg, b):
    B = face_feats.shape[0]
    return pl.pallas_call(
        _bn_concat_fc3_kernel,
        out_shape=jax.ShapeDtypeStruct((B, NPAD), jnp.float32),
    )(face_feats, glob_feats, wf, wg, b)


# ---------------------------------------------------------------------------
# Parameters (deterministic, mirroring the module's kaiming_normal_ / 0.01 init)
# ---------------------------------------------------------------------------
def init_params(key):
    ks = jax.random.split(key, 4)

    def kaiming(k, fan_in, fan_out):
        return jax.random.normal(k, (fan_in, fan_out), jnp.float32) * (2.0 / fan_in) ** 0.5

    p = {}
    # global_fc_main: Linear(2208, 256)
    p["fc_main_w"] = kaiming(ks[0], GFEAT, DG).astype(jnp.bfloat16)
    p["fc_main_b"] = jnp.full((1, DG), 0.01, jnp.float32)
    # attentionfc1: Linear(256, 64)
    p["att1_w"] = kaiming(ks[1], DG, DA).astype(jnp.bfloat16)
    p["att1_b"] = jnp.full((1, DA), 0.01, jnp.float32)
    # attentionfc2: Linear(64, 1) — kept f32, applied as a lane reduction in-kernel
    p["att2_w"] = jax.random.normal(ks[2], (1, DA), jnp.float32) * (2.0 / DA) ** 0.5
    p["att2_b"] = jnp.full((1, 1), 0.01, jnp.float32)
    # global_fc3_debug: Linear(512, 3) — zero-padded to 128 output lanes ONCE at
    # init (lane-dense stores) and split into the face / global halves of the concat.
    w3 = kaiming(ks[3], 2 * DG, NCLASS)
    w3 = jnp.pad(w3, ((0, 0), (0, NPAD - NCLASS)))
    p["fc3_w_face"] = w3[:DG].astype(jnp.bfloat16)
    p["fc3_w_glob"] = w3[DG:].astype(jnp.bfloat16)
    p["fc3_b"] = jnp.pad(jnp.full((NCLASS,), 0.01, jnp.float32),
                         (0, NPAD - NCLASS)).reshape(1, NPAD)
    return p


# ---------------------------------------------------------------------------
# FaceAttention.forward
# ---------------------------------------------------------------------------
@jax.jit
def face_attention_forward(params, global_feature_map, face_features,
                           number_faces, labels=None):
    """FaceAttention forward.

    global_feature_map: (B, 2208, 7, 7) f32  -- global_model(image)
    face_features:      (B, 15, 256)    f32  -- non_align_model(face, labels) per image
    number_faces:       (B,) int32
    labels: only ever forwarded to the external non_align_model; unused here.
    """
    # TODO(synk): the torch.load'ed DenseNet161 `global_model` and the face
    #             `non_align_model` backbones are external checkpoints; their
    #             outputs are taken as inputs instead of being re-implemented.
    # TODO(synk): the three nn.Dropout(p=0.5) layers are identity (eval mode);
    #             training-mode stochastic dropout is not implemented.
    B = global_feature_map.shape[0]
    # Layout plumbing only: NCHW -> (B, spatial, channels) so channels sit on lanes.
    feat = jnp.transpose(global_feature_map, (0, 2, 3, 1)).reshape(B, GH * GW, GFEAT)

    glob = _global_head(feat, params["fc_main_w"], params["fc_main_b"])          # (B,1,256)
    att = _face_attention(number_faces.astype(jnp.int32), face_features,
                          params["att1_w"], params["att1_b"],
                          params["att2_w"], params["att2_b"])                    # (B,1,256)

    logits_pad = _bn_concat_fc3(att.reshape(B, DG), glob.reshape(B, DG),
                                params["fc3_w_face"], params["fc3_w_glob"],
                                params["fc3_b"])                                 # (B,128)
    return logits_pad[:, :NCLASS]


if __name__ == "__main__":
    key = jax.random.PRNGKey(0)
    kp, kg, kf = jax.random.split(key, 3)
    params = init_params(kp)

    B = 2
    global_feature_map = jax.random.normal(kg, (B, GFEAT, GH, GW), jnp.float32)
    face_features = jax.random.normal(kf, (B, MAXF, DG), jnp.float32)
    number_faces = jnp.array([3, 0], jnp.int32)   # exercises masking and the zero-face path

    out = face_attention_forward(params, global_feature_map, face_features, number_faces)
    out = jax.block_until_ready(out)
    assert out.shape == (B, NCLASS) and out.dtype == jnp.float32
    assert bool(jnp.all(jnp.isfinite(out)))
    print("KERNEL_OK")
</pallas_src>

<mosaic_0001>
module attributes {stable_mosaic.version = 11 : i64} {
  func.func @_global_head_kernel(%arg0: i32, %arg1: memref<1x49x2208xf32, #tpu.memory_space<vmem>>, %arg2: memref<2208x256xbf16, #tpu.memory_space<vmem>>, %arg3: memref<1x256xf32, #tpu.memory_space<vmem>>, %arg4: memref<1x1x256xf32, #tpu.memory_space<vmem>>) attributes {dimension_semantics = [#tpu.dimension_semantics<parallel>], iteration_bounds = array<i64: 2>, scalar_prefetch = 0 : i64, scratch_operands = 0 : i64, tpu.core_type = #tpu.core_type<tc>, window_params = [{transform_indices = @transform_0, window_bounds = array<i64: 1, 49, 2208>}, {pipeline_mode = #tpu.pipeline_mode<synchronous>, transform_indices = @transform_1, window_bounds = array<i64: 2208, 256>}, {pipeline_mode = #tpu.pipeline_mode<synchronous>, transform_indices = @transform_2, window_bounds = array<i64: 1, 256>}, {transform_indices = @transform_3, window_bounds = array<i64: 1, 1, 256>}]} {
    %c0 = arith.constant 0 : index
    %c0_0 = arith.constant 0 : index
    %c0_1 = arith.constant 0 : index
    %0 = vector.load %arg1[%c0, %c0_0, %c0_1] : memref<1x49x2208xf32, #tpu.memory_space<vmem>>, vector<1x49x2208xf32>
    %1 = vector.shape_cast %0 : vector<1x49x2208xf32> to vector<49x2208xf32>
    %cst = arith.constant 0.000000e+00 : f32
    %2 = vector.broadcast %cst : f32 to vector<49x2208xf32>
    %3 = arith.maximumf %1, %2 : vector<49x2208xf32>
    %cst_2 = arith.constant dense<0.000000e+00> : vector<2208xf32>
    %4 = vector.multi_reduction <add>, %3, %cst_2 [0] : vector<49x2208xf32> to vector<2208xf32>
    %5 = vector.shape_cast %4 : vector<2208xf32> to vector<1x2208xf32>
    %cst_3 = arith.constant 4.900000e+01 : f32
    %6 = vector.broadcast %cst_3 : f32 to vector<1x2208xf32>
    %7 = arith.divf %5, %6 : vector<1x2208xf32>
    %8 = arith.truncf %7 : vector<1x2208xf32> to vector<1x2208xbf16>
    %c0_4 = arith.constant 0 : index
    %c0_5 = arith.constant 0 : index
    %9 = vector.load %arg2[%c0_4, %c0_5] : memref<2208x256xbf16, #tpu.memory_space<vmem>>, vector<2208x256xbf16>
    %cst_6 = arith.constant dense<0.000000e+00> : vector<1x256xf32>
    %10 = tpu.matmul %8, %9, %cst_6 {dimension_numbers = #tpu.dot_dimension_numbers<[1], [0], [0], [1], [0, 0, 1, 1], [], []>} : vector<1x2208xbf16>, vector<2208x256xbf16>, vector<1x256xf32> -> vector<1x256xf32>
    %c0_7 = arith.constant 0 : index
    %c0_8 = arith.constant 0 : index
    %11 = vector.load %arg3[%c0_7, %c0_8] : memref<1x256xf32, #tpu.memory_space<vmem>>, vector<1x256xf32>
    %12 = arith.addf %10, %11 : vector<1x256xf32>
    %13 = vector.shape_cast %12 : vector<1x256xf32> to vector<1x1x256xf32>
    %c0_9 = arith.constant 0 : index
    %c0_10 = arith.constant 0 : index
    %c0_11 = arith.constant 0 : index
    %14 = vector.load %arg4[%c0_9, %c0_10, %c0_11] : memref<1x1x256xf32, #tpu.memory_space<vmem>>, vector<1x1x256xf32>
    tpu.vector_store %arg4[%c0_9, %c0_10, %c0_11], %13 {strides = array<i32>} : memref<1x1x256xf32, #tpu.memory_space<vmem>>, vector<1x1x256xf32>,
    return
  }
  func.func @transform_0(%arg0: i32) -> (i32, i32, i32) {
    %c0_i32 = arith.constant 0 : i32
    %c0_i32_0 = arith.constant 0 : i32
    %c0_i32_1 = arith.constant 0 : i32
    return %arg0, %c0_i32, %c0_i32_0 : i32, i32, i32
  }
  func.func @transform_1(%arg0: i32) -> (i32, i32) {
    %c0_i32 = arith.constant 0 : i32
    %c0_i32_0 = arith.constant 0 : i32
    %c0_i32_1 = arith.constant 0 : i32
    return %c0_i32, %c0_i32_0 : i32, i32
  }
  func.func @transform_2(%arg0: i32) -> (i32, i32) {
    %c0_i32 = arith.constant 0 : i32
    %c0_i32_0 = arith.constant 0 : i32
    %c0_i32_1 = arith.constant 0 : i32
    return %c0_i32, %c0_i32_0 : i32, i32
  }
  func.func @transform_3(%arg0: i32) -> (i32, i32, i32) {
    %c0_i32 = arith.constant 0 : i32
    %c0_i32_0 = arith.constant 0 : i32
    %c0_i32_1 = arith.constant 0 : i32
    return %arg0, %c0_i32, %c0_i32_0 : i32, i32, i32
  }
}

module attributes {stable_mosaic.version = 11 : i64} {
  func.func @_face_attention_kernel(%arg0: i32, %arg1: memref<2xi32, #tpu.memory_space<smem>>, %arg2: memref<1x15x256xf32, #tpu.memory_space<vmem>>, %arg3: memref<256x64xbf16, #tpu.memory_space<vmem>>, %arg4: memref<1x64xf32, #tpu.memory_space<vmem>>, %arg5: memref<1x64xf32, #tpu.memory_space<vmem>>, %arg6: memref<1x1xf32, #tpu.memory_space<vmem>>, %arg7: memref<1x1x256xf32, #tpu.memory_space<vmem>>) attributes {dimension_semantics = [#tpu.dimension_semantics<parallel>], iteration_bounds = array<i64: 2>, scalar_prefetch = 1 : i64, scratch_operands = 0 : i64, tpu.core_type = #tpu.core_type<tc>, window_params = [{transform_indices = @transform_0, window_bounds = array<i64: 1, 15, 256>}, {pipeline_mode = #tpu.pipeline_mode<synchronous>, transform_indices = @transform_1, window_bounds = array<i64: 256, 64>}, {pipeline_mode = #tpu.pipeline_mode<synchronous>, transform_indices = @transform_2, window_bounds = array<i64: 1, 64>}, {pipeline_mode = #tpu.pipeline_mode<synchronous>, transform_indices = @transform_3, window_bounds = array<i64: 1, 64>}, {pipeline_mode = #tpu.pipeline_mode<synchronous>, transform_indices = @transform_4, window_bounds = array<i64: 1, 1>}, {transform_indices = @transform_5, window_bounds = array<i64: 1, 1, 256>}]} {
    %0 = arith.index_cast %arg0 : i32 to index
    %1 = memref.load %arg1[%0] : memref<2xi32, #tpu.memory_space<smem>>
    %c0 = arith.constant 0 : index
    %c0_0 = arith.constant 0 : index
    %c0_1 = arith.constant 0 : index
    %2 = vector.load %arg2[%c0, %c0_0, %c0_1] : memref<1x15x256xf32, #tpu.memory_space<vmem>>, vector<1x15x256xf32>
    %3 = vector.shape_cast %2 : vector<1x15x256xf32> to vector<15x256xf32>
    %4 = arith.truncf %3 : vector<15x256xf32> to vector<15x256xbf16>
    %c0_2 = arith.constant 0 : index
    %c0_3 = arith.constant 0 : index
    %5 = vector.load %arg3[%c0_2, %c0_3] : memref<256x64xbf16, #tpu.memory_space<vmem>>, vector<256x64xbf16>
    %cst = arith.constant dense<0.000000e+00> : vector<15x64xf32>
    %6 = tpu.matmul %4, %5, %cst {dimension_numbers = #tpu.dot_dimension_numbers<[1], [0], [0], [1], [0, 0, 1, 1], [], []>} : vector<15x256xbf16>, vector<256x64xbf16>, vector<15x64xf32> -> vector<15x64xf32>
    %c0_4 = arith.constant 0 : index
    %c0_5 = arith.constant 0 : index
    %7 = vector.load %arg4[%c0_4, %c0_5] : memref<1x64xf32, #tpu.memory_space<vmem>>, vector<1x64xf32>
    %8 = vector.broadcast %7 : vector<1x64xf32> to vector<15x64xf32>
    %9 = arith.addf %6, %8 : vector<15x64xf32>
    %c0_6 = arith.constant 0 : index
    %c0_7 = arith.constant 0 : index
    %10 = vector.load %arg5[%c0_6, %c0_7] : memref<1x64xf32, #tpu.memory_space<vmem>>, vector<1x64xf32>
    %11 = vector.broadcast %10 : vector<1x64xf32> to vector<15x64xf32>
    %12 = arith.mulf %9, %11 : vector<15x64xf32>
    %cst_8 = arith.constant dense<0.000000e+00> : vector<15xf32>
    %13 = vector.multi_reduction <add>, %12, %cst_8 [1] : vector<15x64xf32> to vector<15xf32>
    %14 = vector.shape_cast %13 : vector<15xf32> to vector<15x1xf32>
    %c0_9 = arith.constant 0 : index
    %c0_10 = arith.constant 0 : index
    %15 = vector.load %arg6[%c0_9, %c0_10] : memref<1x1xf32, #tpu.memory_space<vmem>>, vector<1x1xf32>
    %16 = vector.broadcast %15 : vector<1x1xf32> to vector<15x1xf32>
    %17 = arith.addf %14, %16 : vector<15x1xf32>
    %18 = tpu.iota {dimensions = array<i32: 0>} : vector<15x1xi32>
    %19 = vector.broadcast %1 : i32 to vector<15x1xi32>
    %20 = arith.cmpi sge, %18, %19 : vector<15x1xi32>
    %cst_11 = arith.constant 0xFF800000 : f32
    %21 = vector.broadcast %cst_11 : f32 to vector<15x1xf32>
    %22 = arith.select %20, %21, %17 : vector<15x1xi1>, vector<15x1xf32>
    %cst_12 = arith.constant dense<0xFF800000> : vector<1xf32>
    %23 = vector.multi_reduction <maximumf>, %22, %cst_12 [0] : vector<15x1xf32> to vector<1xf32>
    %24 = vector.shape_cast %23 : vector<1xf32> to vector<1x1xf32>
    %cst_13 = arith.constant 0xFF800000 : f32
    %25 = vector.broadcast %cst_13 : f32 to vector<1x1xf32>
    %26 = arith.cmpf ogt, %24, %25 : vector<1x1xf32>
    %cst_14 = arith.constant 0.000000e+00 : f32
    %27 = vector.broadcast %cst_14 : f32 to vector<1x1xf32>
    %28 = arith.select %26, %24, %27 : vector<1x1xi1>, vector<1x1xf32>
    %29 = vector.broadcast %28 : vector<1x1xf32> to vector<15x1xf32>
    %30 = arith.subf %22, %29 : vector<15x1xf32>
    %31 = math.exp %30 : vector<15x1xf32>
    %cst_15 = arith.constant dense<0.000000e+00> : vector<1xf32>
    %32 = vector.multi_reduction <add>, %31, %cst_15 [0] : vector<15x1xf32> to vector<1xf32>
    %33 = vector.shape_cast %32 : vector<1xf32> to vector<1x1xf32>
    %cst_16 = arith.constant 0.000000e+00 : f32
    %34 = vector.broadcast %cst_16 : f32 to vector<1x1xf32>
    %35 = arith.cmpf ogt, %33, %34 : vector<1x1xf32>
    %cst_17 = arith.constant 1.000000e+00 : f32
    %36 = vector.broadcast %cst_17 : f32 to vector<1x1xf32>
    %37 = arith.divf %36, %33 : vector<1x1xf32>
    %cst_18 = arith.constant 0.000000e+00 : f32
    %38 = vector.broadcast %cst_18 : f32 to vector<1x1xf32>
    %39 = arith.select %35, %37, %38 : vector<1x1xi1>, vector<1x1xf32>
    %40 = vector.broadcast %39 : vector<1x1xf32> to vector<15x1xf32>
    %41 = arith.mulf %31, %40 : vector<15x1xf32>
    %42 = vector.broadcast %41 : vector<15x1xf32> to vector<15x256xf32>
    %43 = arith.mulf %42, %3 : vector<15x256xf32>
    %cst_19 = arith.constant dense<0.000000e+00> : vector<256xf32>
    %44 = vector.multi_reduction <add>, %43, %cst_19 [0] : vector<15x256xf32> to vector<256xf32>
    %45 = vector.shape_cast %44 : vector<256xf32> to vector<1x256xf32>
    %46 = vector.shape_cast %45 : vector<1x256xf32> to vector<1x1x256xf32>
    %c0_20 = arith.constant 0 : index
    %c0_21 = arith.constant 0 : index
    %c0_22 = arith.constant 0 : index
    %47 = vector.load %arg7[%c0_20, %c0_21, %c0_22] : memref<1x1x256xf32, #tpu.memory_space<vmem>>, vector<1x1x256xf32>
    tpu.vector_store %arg7[%c0_20, %c0_21, %c0_22], %46 {strides = array<i32>} : memref<1x1x256xf32, #tpu.memory_space<vmem>>, vector<1x1x256xf32>,
    return
  }
  func.func @transform_0(%arg0: i32, %arg1: memref<2xi32, #tpu.memory_space<smem>>) -> (i32, i32, i32) {
    %c0_i32 = arith.constant 0 : i32
    %c0_i32_0 = arith.constant 0 : i32
    %c0_i32_1 = arith.constant 0 : i32
    return %arg0, %c0_i32, %c0_i32_0 : i32, i32, i32
  }
  func.func @transform_1(%arg0: i32, %arg1: memref<2xi32, #tpu.memory_space<smem>>) -> (i32, i32) {
    %c0_i32 = arith.constant 0 : i32
    %c0_i32_0 = arith.constant 0 : i32
    %c0_i32_1 = arith.constant 0 : i32
    return %c0_i32, %c0_i32_0 : i32, i32
  }
  func.func @transform_2(%arg0: i32, %arg1: memref<2xi32, #tpu.memory_space<smem>>) -> (i32, i32) {
    %c0_i32 = arith.constant 0 : i32
    %c0_i32_0 = arith.constant 0 : i32
    %c0_i32_1 = arith.constant 0 : i32
    return %c0_i32, %c0_i32_0 : i32, i32
  }
  func.func @transform_3(%arg0: i32, %arg1: memref<2xi32, #tpu.memory_space<smem>>) -> (i32, i32) {
    %c0_i32 = arith.constant 0 : i32
    %c0_i32_0 = arith.constant 0 : i32
    %c0_i32_1 = arith.constant 0 : i32
    return %c0_i32, %c0_i32_0 : i32, i32
  }
  func.func @transform_4(%arg0: i32, %arg1: memref<2xi32, #tpu.memory_space<smem>>) -> (i32, i32) {
    %c0_i32 = arith.constant 0 : i32
    %c0_i32_0 = arith.constant 0 : i32
    %c0_i32_1 = arith.constant 0 : i32
    return %c0_i32, %c0_i32_0 : i32, i32
  }
  func.func @transform_5(%arg0: i32, %arg1: memref<2xi32, #tpu.memory_space<smem>>) -> (i32, i32, i32) {
    %c0_i32 = arith.constant 0 : i32
    %c0_i32_0 = arith.constant 0 : i32
    %c0_i32_1 = arith.constant 0 : i32
    return %arg0, %c0_i32, %c0_i32_0 : i32, i32, i32
  }
}

module attributes {stable_mosaic.version = 11 : i64} {
  func.func @_bn_concat_fc3_kernel(%arg0: memref<2x256xf32, #tpu.memory_space<vmem>>, %arg1: memref<2x256xf32, #tpu.memory_space<vmem>>, %arg2: memref<256x128xbf16, #tpu.memory_space<vmem>>, %arg3: memref<256x128xbf16, #tpu.memory_space<vmem>>, %arg4: memref<1x128xf32, #tpu.memory_space<vmem>>, %arg5: memref<2x128xf32, #tpu.memory_space<vmem>>) attributes {dimension_semantics = [], scalar_prefetch = 0 : i64, scratch_operands = 0 : i64, tpu.core_type = #tpu.core_type<tc>} {
    %c0 = arith.constant 0 : index
    %c0_0 = arith.constant 0 : index
    %0 = vector.load %arg0[%c0, %c0_0] : memref<2x256xf32, #tpu.memory_space<vmem>>, vector<2x256xf32>
    %cst = arith.constant dense<0.000000e+00> : vector<256xf32>
    %1 = vector.multi_reduction <add>, %0, %cst [0] : vector<2x256xf32> to vector<256xf32>
    %2 = vector.shape_cast %1 : vector<256xf32> to vector<1x256xf32>
    %cst_1 = arith.constant 2.000000e+00 : f32
    %3 = vector.broadcast %cst_1 : f32 to vector<1x256xf32>
    %4 = arith.divf %2, %3 : vector<1x256xf32>
    %5 = vector.broadcast %4 : vector<1x256xf32> to vector<2x256xf32>
    %6 = arith.subf %0, %5 : vector<2x256xf32>
    %7 = arith.mulf %6, %6 : vector<2x256xf32>
    %cst_2 = arith.constant dense<0.000000e+00> : vector<256xf32>
    %8 = vector.multi_reduction <add>, %7, %cst_2 [0] : vector<2x256xf32> to vector<256xf32>
    %9 = vector.shape_cast %8 : vector<256xf32> to vector<1x256xf32>
    %cst_3 = arith.constant 2.000000e+00 : f32
    %10 = vector.broadcast %cst_3 : f32 to vector<1x256xf32>
    %11 = arith.divf %9, %10 : vector<1x256xf32>
    %12 = vector.broadcast %4 : vector<1x256xf32> to vector<2x256xf32>
    %13 = arith.subf %0, %12 : vector<2x256xf32>
    %cst_4 = arith.constant 9.99999974E-6 : f32
    %14 = vector.broadcast %cst_4 : f32 to vector<1x256xf32>
    %15 = arith.addf %11, %14 : vector<1x256xf32>
    %16 = math.rsqrt %15 : vector<1x256xf32>
    %17 = vector.broadcast %16 : vector<1x256xf32> to vector<2x256xf32>
    %18 = arith.mulf %13, %17 : vector<2x256xf32>
    %c0_5 = arith.constant 0 : index
    %c0_6 = arith.constant 0 : index
    %19 = vector.load %arg1[%c0_5, %c0_6] : memref<2x256xf32, #tpu.memory_space<vmem>>, vector<2x256xf32>
    %cst_7 = arith.constant dense<0.000000e+00> : vector<256xf32>
    %20 = vector.multi_reduction <add>, %19, %cst_7 [0] : vector<2x256xf32> to vector<256xf32>
    %21 = vector.shape_cast %20 : vector<256xf32> to vector<1x256xf32>
    %cst_8 = arith.constant 2.000000e+00 : f32
    %22 = vector.broadcast %cst_8 : f32 to vector<1x256xf32>
    %23 = arith.divf %21, %22 : vector<1x256xf32>
    %24 = vector.broadcast %23 : vector<1x256xf32> to vector<2x256xf32>
    %25 = arith.subf %19, %24 : vector<2x256xf32>
    %26 = arith.mulf %25, %25 : vector<2x256xf32>
    %cst_9 = arith.constant dense<0.000000e+00> : vector<256xf32>
    %27 = vector.multi_reduction <add>, %26, %cst_9 [0] : vector<2x256xf32> to vector<256xf32>
    %28 = vector.shape_cast %27 : vector<256xf32> to vector<1x256xf32>
    %cst_10 = arith.constant 2.000000e+00 : f32
    %29 = vector.broadcast %cst_10 : f32 to vector<1x256xf32>
    %30 = arith.divf %28, %29 : vector<1x256xf32>
    %31 = vector.broadcast %23 : vector<1x256xf32> to vector<2x256xf32>
    %32 = arith.subf %19, %31 : vector<2x256xf32>
    %cst_11 = arith.constant 9.99999974E-6 : f32
    %33 = vector.broadcast %cst_11 : f32 to vector<1x256xf32>
    %34 = arith.addf %30, %33 : vector<1x256xf32>
    %35 = math.rsqrt %34 : vector<1x256xf32>
    %36 = vector.broadcast %35 : vector<1x256xf32> to vector<2x256xf32>
    %37 = arith.mulf %32, %36 : vector<2x256xf32>
    %38 = arith.truncf %18 : vector<2x256xf32> to vector<2x256xbf16>
    %c0_12 = arith.constant 0 : index
    %c0_13 = arith.constant 0 : index
    %39 = vector.load %arg2[%c0_12, %c0_13] : memref<256x128xbf16, #tpu.memory_space<vmem>>, vector<256x128xbf16>
    %cst_14 = arith.constant dense<0.000000e+00> : vector<2x128xf32>
    %40 = tpu.matmul %38, %39, %cst_14 {dimension_numbers = #tpu.dot_dimension_numbers<[1], [0], [0], [1], [0, 0, 1, 1], [], []>} : vector<2x256xbf16>, vector<256x128xbf16>, vector<2x128xf32> -> vector<2x128xf32>
    %41 = arith.truncf %37 : vector<2x256xf32> to vector<2x256xbf16>
    %c0_15 = arith.constant 0 : index
    %c0_16 = arith.constant 0 : index
    %42 = vector.load %arg3[%c0_15, %c0_16] : memref<256x128xbf16, #tpu.memory_space<vmem>>, vector<256x128xbf16>
    %cst_17 = arith.constant dense<0.000000e+00> : vector<2x128xf32>
    %43 = tpu.matmul %41, %42, %cst_17 {dimension_numbers = #tpu.dot_dimension_numbers<[1], [0], [0], [1], [0, 0, 1, 1], [], []>} : vector<2x256xbf16>, vector<256x128xbf16>, vector<2x128xf32> -> vector<2x128xf32>
    %44 = arith.addf %40, %43 : vector<2x128xf32>
    %c0_18 = arith.constant 0 : index
    %c0_19 = arith.constant 0 : index
    %45 = vector.load %arg4[%c0_18, %c0_19] : memref<1x128xf32, #tpu.memory_space<vmem>>, vector<1x128xf32>
    %46 = vector.broadcast %45 : vector<1x128xf32> to vector<2x128xf32>
    %47 = arith.addf %44, %46 : vector<2x128xf32>
    %c0_20 = arith.constant 0 : index
    %c0_21 = arith.constant 0 : index
    %48 = vector.load %arg5[%c0_20, %c0_21] : memref<2x128xf32, #tpu.memory_space<vmem>>, vector<2x128xf32>
    tpu.vector_store %arg5[%c0_20, %c0_21], %47 {strides = array<i32>} : memref<2x128xf32, #tpu.memory_space<vmem>>, vector<2x128xf32>,
    return
  }
}

</mosaic_0001>

<bundles_post_ra>
// kernel: face_attention_forward.4
= control target key start
LH: loop header
LB: loop body
LE: loop exit
PB: predicated region body
PF: predicated region fallthrough
CT: control target
= control target key end

     0   :  { %s851_s0 = inlined_call_operand.vmem [shape: s32[2], index: 0, kind: input, shape index: {}]   ;;  %s852_s1 = inlined_call_operand.vmem [shape: f32[2,15,256], index: 1, kind: input, shape index: {}]   ;;  %s853_s2 = inlined_call_operand.vmem [shape: bf16[256,64], index: 2, kind: input, shape index: {}]   ;;  %s854_s3 = inlined_call_operand.vmem [shape: f32[1,64], index: 3, kind: input, shape index: {}]   ;;  %s855_s4 = inlined_call_operand.vmem [shape: f32[1,64], index: 4, kind: input, shape index: {}]   ;;  %s856_s6 = inlined_call_operand.vmem [shape: f32[2,1,256], index: 6, kind: output, shape index: {}]   ;;  %s857_s5 = inlined_call_operand.<no memory space> [shape: f32[1,1], index: 5, kind: input, shape index: {}]  }
   0x1   :  { %s11_s23 = sshll.u32 %s851_s0, 4  ;;  %v15_v0 = vstv %s857_s5  ;;  %s12_s23 = int_to_ptr.vmem [resolvable:$true] %s11_s23 }
   0x2   :  { %16 = vst [vmem:[#allocation4] sm:$0x1] %v15_v0  ;;  %s678_s26 = scalar_lea.vmem %s12_s23, 16  ;;  %p683_p1 = scmp.lt.s32.totalorder %s12_s23, %s12_s23 }
   0x3   :  { %p679_p0 = scmp.ne.s32.totalorder %s12_s23, %s678_s26  ;;  %p684_p2 = scmp.lt.s32.totalorder %s678_s26, %s678_s26 }
   0x5   :  { %p685_p3 = por %p684_p2, %p683_p1 }
   0x7   :  { %p686_p4 = pnand %p685_p3, %p679_p0 }
   0x9   :  { %689 = shalt.err (!%p686_p4)  }
   0xa   :  { %s700_s27 = smov [#allocation3]  }
   0xb   :  { %14 = dma.vmem_to_smem %s12_s23, 16, %s700_s27, [#allocation2] }
   0xc   :  { %694 = dma.done.wait [#allocation2], 16 }
   0xd   :  { %695 = vsyncadd [#allocation2], 4294967280 }
   0xe   :  { %18 = sfence }
   0xf   :  { %s744_s28 = smov 0  }
  0x10 LB: > { %s750_s0 = sadd.s32 4294967295, %s698_s28   ;;  %p595_p5 = scmp.ge.s32.totalorder %s698_s28, 1  ;;  %s698_s28 = sphi %s744_s28, %s24_s28  }
  0x11   : > { %p196_p6 = scmp.lt.s32.totalorder %s698_s28, 3 }
  0x13   : > { %p197_p7 = pnand %p595_p5, %p196_p6 }
  0x14   : > { %p223_p8 = scmp.lt.s32.totalorder (!%p197_p7), %s750_s0, 1  ;;  %s233_s22 = sld [smem:[#allocation3 + %s750_s0]] (!%p197_p7) }
  0x15   : > { %200 = sbr.rel (%p197_p7) target bundleno = 625 (0x271), region = 40 }
  0x1a   : > { %v656_v1 = vld [vmem:[%s853_s2 + $0x78] sm:$0xff]   ;;  %v658_v3 = vld [vmem:[%s853_s2 + $0x70] sm:$0xff]   ;;  %v660_v5 = vld [vmem:[%s853_s2 + $0x68] sm:$0xff]   ;;  %s771_s14 = scalar_select %p223_p8, %s750_s0, 1  ;;  %vm425_vm0 = vcmask 523264   ;;  %vm429_vm1 = vcmask 522240   ;;  %v442_v38 = vlaneseq  ;;  %v445_v41 = vstv %s233_s22 }
  0x1b   : > { %v657_v2 = vld [vmem:[%s853_s2 + $0x38] sm:$0xff]   ;;  %621 = vmatprep.subr.bf16.mxu0 %v656_v1  ;;  %v659_v4 = vld [vmem:[%s853_s2 + $0x30] sm:$0xff]   ;;  %v661_v6 = vld [vmem:[%s853_s2 + $0x28] sm:$0xff]   ;;  %v701_v37 = vmov 0   ;;  %vm450_vm4 = vcmask 7168   ;;  %vm452_vm5 = vcmask 6144  }
  0x1c   : > { %622 = vmatpush3.bf16.msra.mxu0 %v657_v2  ;;  %v662_v7 = vld [vmem:[%s853_s2 + $0x60] sm:$0xff]   ;;  %s620_s19 = sshll.u32 %s771_s14, 5  ;;  %v664_v9 = vld [vmem:[%s853_s2 + $0x58] sm:$0xff]   ;;  %v666_v11 = vld [vmem:[%s853_s2 + $0x50] sm:$0xff]   ;;  %654 = vset.pattern.permute.xlu1 %v701_v37  ;;  %v830_v40 = vshrl.u32 %v442_v38, 7  ;;  %vm498_vm8 = vcmask 1046528  }
  0x1d   : > { %623 = vmatprep.subr.bf16.mxu0 %v658_v3  ;;  %v663_v8 = vld [vmem:[%s853_s2 + $0x20] sm:$0xff]   ;;  %s227_s26 = scalar_lea.vmem %s852_s1, %s620_s19  ;;  %v665_v10 = vld [vmem:[%s853_s2 + $0x18] sm:$0xff]   ;;  %v667_v15 = vld [vmem:[%s853_s2 + $0x10] sm:$0xff]   ;;  %655 = vset.pattern.permute.xlu0 %v701_v37  ;;  %s598_s0 = sshll.u32 %s771_s14, 1  ;;  %vm535_vm9 = vcmp.lt.s32.totalorder %v442_v38, 256 }
  0x1e   : > { %v795_v12 = vld [vmem:[%s227_s26 + $0x8] sm:$0xff]  ;;  %v797_v13 = vld [vmem:[%s227_s26 + $0x18] sm:$0x7f]  ;;  %v670_v18 = vld [vmem:[%s853_s2 + $0x40] sm:$0xff]   ;;  %v444_v43 = vadd.s32 8, %v830_v40  ;;  %vm446_vm2 = vcmp.ge.s32.totalorder %v830_v40, %v445_v41  ;;  %s231_s25 = scalar_lea.vmem %s856_s6, %s598_s0 }
  0x1f   : > { %v239_v14 = vpack.c.bf16 %v797_v13, %v795_v12  ;;  %v668_v16 = vld [vmem:[%s853_s2 + $0x48] sm:$0xff]   ;;  %v671_v19 = vld [vmem:[%s853_s2] sm:$0xff]   ;;  %v818_v21 = vld [vmem:[%s227_s26 + $0x10] sm:$0x7f] }
  0x20   : > { %624 = vmatpush3.bf16.msra.mxu0 %v659_v4  ;;  %v669_v17 = vld [vmem:[%s853_s2 + $0x8] sm:$0xff]   ;;  %v816_v20 = vld [vmem:[%s227_s26] sm:$0xff]  ;;  %vm447_vm3 = vcmp.ge.s32.totalorder %v444_v43, %v445_v41 }
  0x21   : > { %625 = vmatprep.subr.bf16.mxu0 %v660_v5  ;;  %407 = vmatprep.mubr.bf16.mxu0 %v239_v14  ;;  %v238_v22 = vpack.c.bf16 %v818_v21, %v816_v20  ;;  %v599_v24 = vld [vmem:[%s854_s3] ss:$0 sm:$0xff] }
  0x22   : > { %v616_v28 = vld [vmem:[%s855_s4] ss:$0 sm:$0xff] }
  0x23   : > { %v617_v39 = vld [vmem:[#allocation4] ss:$0 sm:$0xff] }
  0x24   : > { %626 = vmatpush3.bf16.msra.mxu0 %v661_v6 }
  0x25   : > { %627 = vmatprep.subr.bf16.mxu0 %v662_v7 }
  0x28   : > { %628 = vmatpush3.bf16.msra.mxu0 %v663_v8 }
  0x29   : > { %629 = vmatprep.subr.bf16.mxu0 %v664_v9 }
  0x2c   : > { %630 = vmatpush3.bf16.msra.mxu0 %v665_v10 }
  0x2d   : > { %631 = vmatprep.subr.bf16.mxu0 %v666_v11 }
  0x30   : > { %632 = vmatpush3.bf16.msra.mxu0 %v667_v15 }
  0x31   : > { %633 = vmatprep.subr.bf16.mxu0 %v668_v16 }
  0x34   : > { %634 = vmatpush3.bf16.msra.mxu0 %v669_v17 }
  0x35   : > { %635 = vmatprep.subr.bf16.mxu0 %v670_v18 }
  0x38   : > { %636 = vmatpush3.bf16.msra.mxu0 %v671_v19 }
  0x3b   : > { %408 = vmatmul.mubr.bf16.vlgmr.msra.gmra.mxu0 %v238_v22 }
  0xfb   : > { %v637_v23 = vpop.f32.mrf.mxu0 }
  0xfd   : > { %v638_v25 = vpop.f32.mrf.mxu0 }
  0xfe   : > { %v639_v26 = vadd.f32 %v638_v25, %v637_v23 }
  0xff   : > { %v640_v27 = vpop.f32.mrf.mxu0 }
 0x100   : > { %v410_v29 = vadd.f32 %v639_v26, %v599_v24 }
 0x101   : > { %v641_v30 = vpop.f32.mrf.mxu0 }
 0x102   : > { %v642_v31 = vadd.f32 %v641_v30, %v640_v27  ;;  %v423_v32 = vmul.f32 %v616_v28, %v410_v29  ;;  %v702_v30 = vmov 1966171168  }
 0x104   : > { %v413_v33 = vadd.f32 %v642_v31, %v599_v24  ;;  %v426_v34 = vsel %vm425_vm0, %v423_v32, 0.0  ;;  %v519_v31 = vunpack.c.l.s4 %v702_v30 }
 0x105   : > { %427 = vadd.xlane.f32.xlu0 %v426_v34 }
 0x106   : > { %v424_v35 = vmul.f32 %v616_v28, %v413_v33 }
 0x108   : > { %v430_v36 = vsel %vm429_vm1, %v424_v35, 0.0 }
 0x109   : > { %431 = vadd.xlane.f32.xlu0 %v430_v36 }
 0x18e   : > { %v428_v42 = vpop.xlane.xlu0 %427 }
 0x18f   : > { %v440_v44 = vadd.f32 %v617_v39, %v428_v42 }
 0x191   : > { %v448_v46 = vsel %vm446_vm2, -inf, %v440_v44 }
 0x192   : > { %v432_v45 = vpop.xlane.xlu0 %431  ;;  %v451_v49 = vsel %vm450_vm4, %v448_v46, -inf }
 0x193   : > { %v441_v47 = vadd.f32 %v617_v39, %v432_v45 }
 0x195   : > { %v449_v48 = vsel %vm447_vm3, -inf, %v441_v47 }
 0x196   : > { %v453_v50 = vsel %vm452_vm5, %v449_v48, -inf }
 0x197   : > { %v454_v51 = vmax.f32 %v451_v49, %v453_v50 }
 0x199   : > { %v455_v52 = vrot.slane %v454_v51, 4 }
 0x19b   : > { %v456_v53 = vmax.f32 %v454_v51, %v455_v52 }
 0x19d   : > { %v457_v54 = vrot.slane %v456_v53, 2 }
 0x19f   : > { %v458_v55 = vmax.f32 %v456_v53, %v457_v54 }
 0x1a1   : > { %v459_v56 = vrot.slane %v458_v55, 1 }
 0x1a3   : > { %v460_v57 = vmax.f32 %v458_v55, %v459_v56 }
 0x1a5   : > { %vm461_vm6 = vcmp.gt.f32.partialorder %v460_v57, -inf }
 0x1a6   : > { %v462_v58 = vsel %vm461_vm6, %v460_v57, 0.0 }
 0x1a7   : > { %v463_v59 = vsub.f32 %v448_v46, %v462_v58  ;;  %v464_v60 = vsub.f32 %v449_v48, %v462_v58 }
 0x1a9   : > { %v465_v61 = vmul.f32 1.442695, %v463_v59  ;;  %v467_v62 = vmul.f32 1.442695, %v464_v60 }
 0x1ab   : > { %672 = vpow2.f32 %v465_v61 }
 0x1ac   : > { %674 = vpow2.f32 %v467_v62 }
 0x1b8   : > { %v673_v63 = vpop.eup %672 }
 0x1b9   : > { %v675_v0 = vpop.eup %674  ;;  %v469_v1 = vsel %vm450_vm4, %v673_v63, 0.0 }
 0x1ba   : > { %v470_v2 = vsel %vm452_vm5, %v675_v0, 0.0 }
 0x1bb   : > { %v471_v3 = vadd.f32 %v470_v2, %v469_v1 }
 0x1bd   : > { %v472_v4 = vrot.slane %v471_v3, 4 }
 0x1bf   : > { %v473_v5 = vadd.f32 %v472_v4, %v471_v3 }
 0x1c1   : > { %v474_v6 = vrot.slane %v473_v5, 2 }
 0x1c3   : > { %v475_v7 = vadd.f32 %v474_v6, %v473_v5 }
 0x1c5   : > { %v476_v8 = vrot.slane %v475_v7, 1 }
 0x1c7   : > { %v477_v9 = vadd.f32 %v476_v8, %v475_v7 }
 0x1c9   : > { %676 = vrcp.f32 %v477_v9  ;;  %vm478_vm7 = vcmp.gt.f32.partialorder %v477_v9, 0.0 }
 0x1d6   : > { %v677_v10 = vpop.eup %676 }
 0x1d7   : > { %v481_v11 = vsel %vm478_vm7, %v677_v10, 0.0 }
 0x1d8   : > { %v483_v14 = vmul.f32 %v675_v0, %v481_v11  ;;  %v482_v15 = vmul.f32 %v673_v63, %v481_v11 }
 0x1da   : > { %491 = vperm.xlu1 %654, %v483_v14  }
 0x1de   : > { %486 = vperm.xlu1 %654, %v482_v15  }
 0x255   : > { %v492_v16 = vpop.permute.xlu1 %491 }
 0x256   : > { %v496_v17 = vmul.f32 %v492_v16, %v818_v21  ;;  %v497_v18 = vmul.f32 %v492_v16, %v797_v13  ;;  %v520_v13 = vunpack.c.0.s8 %v519_v31 }
 0x258   : > { %v499_v24 = vsel %vm498_vm8, %v496_v17, 0.0  ;;  %v507_v25 = vsel %vm498_vm8, %v497_v18, 0.0 }
 0x259   : > { %v487_v19 = vpop.permute.xlu1 %486 }
 0x25a   : > { %v494_v22 = vmul.f32 %v487_v19, %v816_v20  ;;  %v495_v23 = vmul.f32 %v487_v19, %v795_v12  ;;  %v523_v12 = vsub.s32 %v520_v13, %v830_v40 }
 0x25c   : > { %v500_v26 = vadd.f32 %v499_v24, %v494_v22  ;;  %v508_v27 = vadd.f32 %v507_v25, %v495_v23 }
 0x25e   : > { %v501_v28 = vrot.slane %v500_v26, 4  ;;  %v509_v29 = vrot.slane %v508_v27, 4 }
 0x260   : > { %v502_v32 = vadd.f32 %v501_v28, %v500_v26  ;;  %v510_v33 = vadd.f32 %v509_v29, %v508_v27 }
 0x262   : > { %v503_v21 = vrot.slane %v502_v32, 2  ;;  %v511_v34 = vrot.slane %v510_v33, 2 }
 0x264   : > { %v504_v35 = vadd.f32 %v503_v21, %v502_v32  ;;  %v512_v36 = vadd.f32 %v511_v34, %v510_v33 }
 0x266   : > { %v505_v37 = vrot.slane %v504_v35, 1  ;;  %v513_v20 = vrot.slane %v512_v36, 1 }
 0x268   : > { %v506_v39 = vadd.f32 %v505_v37, %v504_v35  ;;  %v514_v41 = vadd.f32 %v513_v20, %v512_v36 }
 0x26a   : > { %v517_v42 = vcombine.low %v506_v39, %v514_v41 }
 0x26c   : > { %v524_v43 = vrot.slane %v517_v42, %v523_v12 }
 0x26e   : > { %v531_v44 = vrot.slane %v524_v43, %v523_v12 }
 0x270   : > { %537 = vst.msk [vmem:[%s231_s25] sm:$0x3] %vm535_vm9, %v531_v44 }
 0x271 PF: > { %s24_s28 = sadd.s32 1, %s698_s28  }
 0x272   : > { %p21_p9 = scmp.ge.s32.totalorder %s24_s28, 4  }
 0x274   :  { %23 = sbr.rel (!%p21_p9) target bundleno = 16 (0x10), region = 70 }

// kernel: face_attention_forward.5
= control target key start
LH: loop header
LB: loop body
LE: loop exit
PB: predicated region body
PF: predicated region fallthrough
CT: control target
= control target key end

     0   :  { %v27_v30 = vlaneseq  ;;  %v718_v33 = vmov 1983009808   ;;  %s878_s0 = inlined_call_operand.vmem [shape: f32[2,256], index: 0, kind: input, shape index: {}]   ;;  %s879_s1 = inlined_call_operand.vmem [shape: f32[2,256], index: 1, kind: input, shape index: {}]   ;;  %s880_s2 = inlined_call_operand.vmem [shape: bf16[256,128], index: 2, kind: input, shape index: {}]   ;;  %s881_s3 = inlined_call_operand.vmem [shape: bf16[256,128], index: 3, kind: input, shape index: {}]   ;;  %s882_s4 = inlined_call_operand.vmem [shape: f32[1,128], index: 4, kind: input, shape index: {}]   ;;  %s883_s5 = inlined_call_operand.hbm [shape: f32[2,128], index: 5, kind: output, shape index: {}]  }
   0x1   :  { %v656_v0 = vld [vmem:[%s881_s3 + $0x78] sm:$0xff]   ;;  %v660_v4 = vld [vmem:[%s881_s3 + $0x70] sm:$0xff]   ;;  %v664_v8 = vld [vmem:[%s881_s3 + $0x68] sm:$0xff]   ;;  %v25_v34 = vunpack.c.l.s4 %v718_v33 }
   0x2   :  { %v657_v1 = vld [vmem:[%s880_s2 + $0x78] sm:$0xff]   ;;  %610 = vmatprep.subr.bf16.mxu0 %v656_v0  ;;  %v661_v5 = vld [vmem:[%s880_s2 + $0x70] sm:$0xff]   ;;  %v665_v9 = vld [vmem:[%s880_s2 + $0x68] sm:$0xff]   ;;  %v28_v35 = vshrl.u32 %v27_v30, 7 }
   0x3   :  { %v658_v2 = vld [vmem:[%s881_s3 + $0x38] sm:$0xff]   ;;  %632 = vmatprep.subr.bf16.mxu1 %v657_v1  ;;  %v662_v6 = vld [vmem:[%s881_s3 + $0x30] sm:$0xff]   ;;  %v666_v10 = vld [vmem:[%s881_s3 + $0x28] sm:$0xff]  }
   0x4   :  { %v659_v3 = vld [vmem:[%s880_s2 + $0x38] sm:$0xff]   ;;  %611 = vmatpush3.bf16.msra.mxu0 %v658_v2  ;;  %v663_v7 = vld [vmem:[%s880_s2 + $0x30] sm:$0xff]   ;;  %v667_v11 = vld [vmem:[%s880_s2 + $0x28] sm:$0xff]  }
   0x5   :  { %633 = vmatpush3.bf16.msra.mxu1 %v659_v3  ;;  %612 = vmatprep.subr.bf16.mxu0 %v660_v4  ;;  %v668_v12 = vld [vmem:[%s881_s3 + $0x60] sm:$0xff]   ;;  %v672_v16 = vld [vmem:[%s881_s3 + $0x58] sm:$0xff]   ;;  %v676_v20 = vld [vmem:[%s881_s3 + $0x50] sm:$0xff]  }
   0x6   :  { %634 = vmatprep.subr.bf16.mxu1 %v661_v5  ;;  %v669_v13 = vld [vmem:[%s880_s2 + $0x60] sm:$0xff]   ;;  %v673_v17 = vld [vmem:[%s880_s2 + $0x58] sm:$0xff]   ;;  %v677_v21 = vld [vmem:[%s880_s2 + $0x50] sm:$0xff]  }
   0x7   :  { %v670_v14 = vld [vmem:[%s881_s3 + $0x20] sm:$0xff]   ;;  %v674_v18 = vld [vmem:[%s881_s3 + $0x18] sm:$0xff]   ;;  %v678_v22 = vld [vmem:[%s881_s3 + $0x10] sm:$0xff]  }
   0x8   :  { %613 = vmatpush3.bf16.msra.mxu0 %v662_v6  ;;  %v671_v15 = vld [vmem:[%s880_s2 + $0x20] sm:$0xff]   ;;  %v675_v19 = vld [vmem:[%s880_s2 + $0x18] sm:$0xff]   ;;  %v679_v23 = vld [vmem:[%s880_s2 + $0x10] sm:$0xff]  }
   0x9   :  { %635 = vmatpush3.bf16.msra.mxu1 %v663_v7  ;;  %614 = vmatprep.subr.bf16.mxu0 %v664_v8  ;;  %v680_v24 = vld [vmem:[%s881_s3 + $0x48] sm:$0xff]   ;;  %v684_v28 = vld [vmem:[%s881_s3 + $0x40] sm:$0xff]  }
   0xa   :  { %636 = vmatprep.subr.bf16.mxu1 %v665_v9  ;;  %v681_v25 = vld [vmem:[%s880_s2 + $0x48] sm:$0xff]   ;;  %v685_v29 = vld [vmem:[%s880_s2 + $0x40] sm:$0xff]  }
   0xb   :  { %v682_v26 = vld [vmem:[%s881_s3 + $0x8] sm:$0xff]   ;;  %v686_v31 = vld [vmem:[%s881_s3] sm:$0xff]  }
   0xc   :  { %615 = vmatpush3.bf16.msra.mxu0 %v666_v10  ;;  %v683_v27 = vld [vmem:[%s880_s2 + $0x8] sm:$0xff]   ;;  %v687_v32 = vld [vmem:[%s880_s2] sm:$0xff]  }
   0xd   :  { %637 = vmatpush3.bf16.msra.mxu1 %v667_v11  ;;  %616 = vmatprep.subr.bf16.mxu0 %v668_v12 }
   0xe   :  { %638 = vmatprep.subr.bf16.mxu1 %v669_v13 }
  0x10   :  { %617 = vmatpush3.bf16.msra.mxu0 %v670_v14 }
  0x11   :  { %639 = vmatpush3.bf16.msra.mxu1 %v671_v15  ;;  %618 = vmatprep.subr.bf16.mxu0 %v672_v16 }
  0x12   :  { %640 = vmatprep.subr.bf16.mxu1 %v673_v17 }
  0x14   :  { %619 = vmatpush3.bf16.msra.mxu0 %v674_v18 }
  0x15   :  { %641 = vmatpush3.bf16.msra.mxu1 %v675_v19  ;;  %620 = vmatprep.subr.bf16.mxu0 %v676_v20 }
  0x16   :  { %642 = vmatprep.subr.bf16.mxu1 %v677_v21 }
  0x18   :  { %621 = vmatpush3.bf16.msra.mxu0 %v678_v22 }
  0x19   :  { %643 = vmatpush3.bf16.msra.mxu1 %v679_v23  ;;  %622 = vmatprep.subr.bf16.mxu0 %v680_v24 }
  0x1a   :  { %644 = vmatprep.subr.bf16.mxu1 %v681_v25 }
  0x1c   :  { %623 = vmatpush3.bf16.msra.mxu0 %v682_v26 }
  0x1d   :  { %645 = vmatpush3.bf16.msra.mxu1 %v683_v27  ;;  %624 = vmatprep.subr.bf16.mxu0 %v684_v28 }
  0x1e   :  { %646 = vmatprep.subr.bf16.mxu1 %v685_v29 }
  0x20   :  { %625 = vmatpush3.bf16.msra.mxu0 %v686_v31 }
  0x21   :  { %647 = vmatpush3.bf16.msra.mxu1 %v687_v32 }
  0x22   :  { %10 = vsyncpa [#allocation3], 0  ;;  %v26_v36 = vunpack.c.0.s8 %v25_v34  ;;  %v108_v37 = vld [vmem:[%s879_s1] sm:$0xf]  ;;  %vm34_vm0 = vcmask 1041408   ;;  %s719_s2 = smov [#allocation2]  }
  0x23   :  { %v22_v38 = vld [vmem:[%s878_s0] sm:$0xf]  ;;  %s569_s3 = sshll.u32 %s719_s2, 4  ;;  %s570_s3 = int_to_ptr.vmem [resolvable:$true] %s569_s3 }
  0x24   :  { %v852_v39 = vsub.s32 %v26_v36, %v28_v35  ;;  %s696_s11 = scalar_lea.vmem %s570_s3, 32  ;;  %p701_p1 = scmp.lt.s32.totalorder %s570_s3, %s570_s3 }
  0x25   :  { %p697_p0 = scmp.ne.s32.totalorder %s570_s3, %s696_s11  ;;  %p702_p2 = scmp.lt.s32.totalorder %s696_s11, %s696_s11 }
  0x26   :  { %v116_v40 = vrot.slane %v108_v37, %v852_v39  ;;  %v30_v41 = vrot.slane %v22_v38, %v852_v39 }
  0x27   :  { %p703_p3 = por %p702_p2, %p701_p1 }
  0x28   :  { %v117_v42 = vcombine.high %v116_v40, %v116_v40  ;;  %v120_v43 = vsel %vm34_vm0, %v116_v40, 0.0  ;;  %v31_v44 = vcombine.high %v30_v41, %v30_v41  ;;  %v35_v45 = vsel %vm34_vm0, %v30_v41, 0.0 }
  0x29   :  { %v121_v46 = vrot.slane %v120_v43, 4  ;;  %v36_v47 = vrot.slane %v35_v45, 4  ;;  %p704_p4 = pnand %p703_p3, %p697_p0 }
  0x2a   :  { %v127_v48 = vsel %vm34_vm0, %v117_v42, 0.0  ;;  %v42_v49 = vsel %vm34_vm0, %v31_v44, 0.0 }
  0x2b   :  { %v122_v50 = vadd.f32 %v121_v46, %v120_v43  ;;  %v128_v51 = vrot.slane %v127_v48, 4  ;;  %v37_v52 = vadd.f32 %v36_v47, %v35_v45  ;;  %v43_v53 = vrot.slane %v42_v49, 4 }
  0x2d   :  { %v123_v54 = vrot.slane %v122_v50, 2  ;;  %v129_v55 = vadd.f32 %v128_v51, %v127_v48  ;;  %v38_v56 = vrot.slane %v37_v52, 2  ;;  %v44_v57 = vadd.f32 %v43_v53, %v42_v49 }
  0x2f   :  { %v124_v58 = vadd.f32 %v123_v54, %v122_v50  ;;  %v130_v59 = vrot.slane %v129_v55, 2  ;;  %v39_v60 = vadd.f32 %v38_v56, %v37_v52  ;;  %v45_v61 = vrot.slane %v44_v57, 2 }
  0x31   :  { %v125_v62 = vrot.slane %v124_v58, 1  ;;  %v131_v63 = vadd.f32 %v130_v59, %v129_v55  ;;  %v40_v0 = vrot.slane %v39_v60, 1  ;;  %v46_v1 = vadd.f32 %v45_v61, %v44_v57 }
  0x33   :  { %v126_v2 = vadd.f32 %v125_v62, %v124_v58  ;;  %v132_v3 = vrot.slane %v131_v63, 1  ;;  %v41_v4 = vadd.f32 %v40_v0, %v39_v60  ;;  %v47_v5 = vrot.slane %v46_v1, 1 }
  0x35   :  { %v133_v6 = vadd.f32 %v132_v3, %v131_v63  ;;  %v134_v7 = vmul.f32 0.5, %v126_v2  ;;  %v48_v8 = vadd.f32 %v47_v5, %v46_v1  ;;  %v50_v9 = vmul.f32 0.5, %v41_v4 }
  0x37   :  { %v135_v10 = vmul.f32 0.5, %v133_v6  ;;  %v51_v11 = vmul.f32 0.5, %v48_v8 }
  0x39   :  { %v138_v12 = vcombine.low %v134_v7, %v135_v10  ;;  %v54_v13 = vcombine.low %v50_v9, %v51_v11 }
  0x3b   :  { %v145_v14 = vrot.slane %v138_v12, %v852_v39  ;;  %v61_v15 = vrot.slane %v54_v13, %v852_v39 }
  0x3d   :  { %v147_v16 = vsub.f32 %v108_v37, %v145_v14  ;;  %v63_v17 = vsub.f32 %v22_v38, %v61_v15 }
  0x3f   :  { %v148_v18 = vmul.f32 %v147_v16, %v147_v16  ;;  %v64_v19 = vmul.f32 %v63_v17, %v63_v17 }
  0x41   :  { %v156_v20 = vrot.slane %v148_v18, %v852_v39  ;;  %v72_v21 = vrot.slane %v64_v19, %v852_v39 }
  0x43   :  { %v157_v22 = vcombine.high %v156_v20, %v156_v20  ;;  %v160_v23 = vsel %vm34_vm0, %v156_v20, 0.0  ;;  %v73_v24 = vcombine.high %v72_v21, %v72_v21  ;;  %v76_v25 = vsel %vm34_vm0, %v72_v21, 0.0 }
  0x44   :  { %v161_v26 = vrot.slane %v160_v23, 4  ;;  %v77_v27 = vrot.slane %v76_v25, 4 }
  0x45   :  { %v167_v28 = vsel %vm34_vm0, %v157_v22, 0.0  ;;  %v83_v29 = vsel %vm34_vm0, %v73_v24, 0.0 }
  0x46   :  { %v162_v30 = vadd.f32 %v161_v26, %v160_v23  ;;  %v168_v31 = vrot.slane %v167_v28, 4  ;;  %v78_v32 = vadd.f32 %v77_v27, %v76_v25  ;;  %v84_v33 = vrot.slane %v83_v29, 4 }
  0x48   :  { %v163_v34 = vrot.slane %v162_v30, 2  ;;  %v169_v35 = vadd.f32 %v168_v31, %v167_v28  ;;  %v79_v36 = vrot.slane %v78_v32, 2  ;;  %v85_v37 = vadd.f32 %v84_v33, %v83_v29 }
  0x4a   :  { %v164_v38 = vadd.f32 %v163_v34, %v162_v30  ;;  %v170_v40 = vrot.slane %v169_v35, 2  ;;  %v80_v41 = vadd.f32 %v79_v36, %v78_v32  ;;  %v86_v42 = vrot.slane %v85_v37, 2 }
  0x4c   :  { %v165_v43 = vrot.slane %v164_v38, 1  ;;  %v171_v44 = vadd.f32 %v170_v40, %v169_v35  ;;  %v81_v45 = vrot.slane %v80_v41, 1  ;;  %v87_v46 = vadd.f32 %v86_v42, %v85_v37 }
  0x4e   :  { %v166_v47 = vadd.f32 %v165_v43, %v164_v38  ;;  %v172_v48 = vrot.slane %v171_v44, 1  ;;  %v82_v49 = vadd.f32 %v81_v45, %v80_v41  ;;  %v88_v50 = vrot.slane %v87_v46, 1 }
  0x50   :  { %v173_v51 = vadd.f32 %v172_v48, %v171_v44  ;;  %v174_v52 = vmul.f32 0.5, %v166_v47  ;;  %v89_v53 = vadd.f32 %v88_v50, %v87_v46  ;;  %v90_v54 = vmul.f32 0.5, %v82_v49 }
  0x52   :  { %v175_v55 = vmul.f32 0.5, %v173_v51  ;;  %v176_v56 = vadd.f32 1e-05, %v174_v52  ;;  %v91_v57 = vmul.f32 0.5, %v89_v53  ;;  %v92_v58 = vadd.f32 1e-05, %v90_v54 }
  0x54   :  { %v177_v59 = vadd.f32 1e-05, %v175_v55  ;;  %688 = vrsqrt.f32 %v176_v56  ;;  %v93_v60 = vadd.f32 1e-05, %v91_v57 }
  0x55   :  { %690 = vrsqrt.f32 %v92_v58 }
  0x56   :  { %692 = vrsqrt.f32 %v177_v59 }
  0x57   :  { %694 = vrsqrt.f32 %v93_v60 }
  0x61   :  { %v689_v61 = vpop.eup %688 }
  0x62   :  { %v691_v62 = vpop.eup %690 }
  0x63   :  { %v693_v63 = vpop.eup %692 }
  0x64   :  { %v695_v0 = vpop.eup %694  ;;  %v182_v1 = vcombine.low %v689_v61, %v693_v63 }
  0x65   :  { %v98_v2 = vcombine.low %v691_v62, %v695_v0 }
  0x66   :  { %v189_v3 = vrot.slane %v182_v1, %v852_v39 }
  0x67   :  { %v105_v4 = vrot.slane %v98_v2, %v852_v39 }
  0x68   :  { %v191_v5 = vmul.f32 %v189_v3, %v147_v16 }
  0x69   :  { %v107_v6 = vmul.f32 %v105_v4, %v63_v17 }
  0x6a   :  { %v244_v7 = vrot.slane %v191_v5, %v852_v39 }
  0x6b   :  { %v199_v8 = vrot.slane %v107_v6, %v852_v39  ;;  %v609_v39 = vld [vmem:[%s882_s4] ss:$0 sm:$0xff] }
  0x6c   :  { %v245_v9 = vcombine.high %v244_v7, %v244_v7  ;;  %v248_v11 = vpack.c.bf16 %v244_v7, %v244_v7 }
  0x6d   :  { %v200_v10 = vcombine.high %v199_v8, %v199_v8  ;;  %v203_v13 = vpack.c.bf16 %v199_v8, %v199_v8 }
  0x6e   :  { %v249_v12 = vpack.c.bf16 %v245_v9, %v245_v9 }
  0x6f   :  { %v204_v14 = vpack.c.bf16 %v200_v10, %v200_v10 }
  0x70   :  { %410 = vmatprep.mubr.bf16.mxu0 %v249_v12 }
  0x71   :  { %546 = vmatprep.mubr.bf16.mxu1 %v204_v14  ;;  %411 = vmatmul.mubr.bf16.vlgmr.msra.gmra.mxu0 %v248_v11 }
  0x72   :  { %547 = vmatmul.mubr.bf16.vlgmr.msra.gmra.mxu1 %v203_v13 }
 0x131   :  { %v626_v15 = vpop.f32.mrf.mxu0 }
 0x132   :  { %v648_v18 = vpop.f32.mrf.mxu1 }
 0x133   :  { %v627_v19 = vpop.f32.mrf.mxu0 }
 0x134   :  { %v628_v20 = vadd.f32 %v627_v19, %v626_v15  ;;  %v649_v16 = vpop.f32.mrf.mxu1 }
 0x135   :  { %v650_v17 = vadd.f32 %v649_v16, %v648_v18  ;;  %v629_v21 = vpop.f32.mrf.mxu0 }
 0x136   :  { %v651_v22 = vpop.f32.mrf.mxu1 }
 0x137   :  { %v549_v23 = vadd.f32 %v650_v17, %v628_v20  ;;  %v630_v24 = vpop.f32.mrf.mxu0 }
 0x138   :  { %v652_v25 = vpop.f32.mrf.mxu1 }
 0x139   :  { %v561_v26 = vadd.f32 %v609_v39, %v549_v23 }
 0x13b   :  { %562 = vst [vmem:[#allocation2] sm:$0x3] %v561_v26 }
 0x13c   :  { %707 = shalt.err (!%p704_p4)
}
 0x13d   :  { %572 = dma.vmem_to_hbm [thread:$0]  %s570_s3, 32, %s883_s5, [#allocation3]  }
 0x13e   :  { %716 = dma.done.wait [#allocation3], 32  }
 0x13f   :  { %717 = vsyncadd [#allocation3], 4294967264 }
 0x140   :  { %576 = vsyncpa [#allocation3], 1 }

// kernel: face_attention_forward.3
= control target key start
LH: loop header
LB: loop body
LE: loop exit
PB: predicated region body
PF: predicated region fallthrough
CT: control target
= control target key end

     0   :  { %s3557_s12 = smov 0   ;;  %s4573_s0 = inlined_call_operand.vmem [shape: f32[2,49,2208], index: 0, kind: input, shape index: {}]   ;;  %s4574_s1 = inlined_call_operand.vmem [shape: bf16[2208,256], index: 1, kind: input, shape index: {}]   ;;  %s4575_s2 = inlined_call_operand.vmem [shape: f32[1,256], index: 2, kind: input, shape index: {}]   ;;  %s4576_s3 = inlined_call_operand.vmem [shape: f32[2,1,256], index: 3, kind: output, shape index: {}]  }
   0x1 LB: > { %s2818_s13 = sadd.s32 4294967295, %s3534_s12   ;;  %p2822_p0 = scmp.ge.s32.totalorder %s3534_s12, 1  ;;  %s3534_s12 = sphi %s3557_s12, %s13_s12  }
   0x2   : > { %p137_p1 = scmp.lt.s32.totalorder %s3534_s12, 3 }
   0x4   : > { %p138_p2 = pnand %p2822_p0, %p137_p1 }
   0x5   : > { %p160_p3 = scmp.lt.s32.totalorder (!%p138_p2), %s2818_s13, 1 }
   0x6   : > { %141 = sbr.rel (%p138_p2) target bundleno = 514 (0x202), region = 32 }
   0xb   : > { %v3114_v0 = vld [vmem:[%s4574_s1 + $0x74] ss:$8 sps:$4 sm:$0xff]   ;;  %v3116_v1 = vld [vmem:[%s4574_s1 + $0x70] ss:$8 sps:$4 sm:$0xff]   ;;  %v3120_v4 = vld [vmem:[%s4574_s1 + $0x64] ss:$8 sps:$4 sm:$0xff]  }
   0xc   : > { %2373 = vmatprep.subr.bf16.mxu0 %v3114_v0  ;;  %v3117_v2 = vld [vmem:[%s4574_s1 + $0x174] ss:$8 sps:$4 sm:$0xff]   ;;  %v3119_v3 = vld [vmem:[%s4574_s1 + $0x170] ss:$8 sps:$4 sm:$0xff]   ;;  %v3122_v5 = vld [vmem:[%s4574_s1 + $0x60] ss:$8 sps:$4 sm:$0xff]  }
   0xd   : > { %2374 = vmatpush1.bf16.msra.mxu0 %v3116_v1  ;;  %2414 = vmatprep.subr.bf16.mxu1 %v3117_v2  ;;  %v3123_v6 = vld [vmem:[%s4574_s1 + $0x164] ss:$8 sps:$4 sm:$0xff]   ;;  %v3125_v7 = vld [vmem:[%s4574_s1 + $0x160] ss:$8 sps:$4 sm:$0xff]   ;;  %v3126_v8 = vld [vmem:[%s4574_s1 + $0x54] ss:$8 sps:$4 sm:$0xff]  }
   0xe   : > { %2415 = vmatpush1.bf16.msra.mxu1 %v3119_v3  ;;  %2375 = vmatprep.subr.bf16.mxu0 %v3120_v4  ;;  %v3128_v9 = vld [vmem:[%s4574_s1 + $0x50] ss:$8 sps:$4 sm:$0xff]   ;;  %v3129_v10 = vld [vmem:[%s4574_s1 + $0x154] ss:$8 sps:$4 sm:$0xff]   ;;  %v3132_v11 = vld [vmem:[%s4574_s1 + $0x44] ss:$8 sps:$4 sm:$0xff]  }
   0xf   : > { %2416 = vmatprep.subr.bf16.mxu1 %v3123_v6  ;;  %v3131_v12 = vld [vmem:[%s4574_s1 + $0x150] ss:$8 sps:$4 sm:$0xff]   ;;  %v3135_v13 = vld [vmem:[%s4574_s1 + $0x144] ss:$8 sps:$4 sm:$0xff]   ;;  %v3134_v14 = vld [vmem:[%s4574_s1 + $0x40] ss:$8 sps:$4 sm:$0xff]  }
  0x10   : > { %v3138_v15 = vld [vmem:[%s4574_s1 + $0x34] ss:$8 sps:$4 sm:$0xff]   ;;  %v3137_v16 = vld [vmem:[%s4574_s1 + $0x140] ss:$8 sps:$4 sm:$0xff]   ;;  %v3140_v18 = vld [vmem:[%s4574_s1 + $0x30] ss:$8 sps:$4 sm:$0xff]  }
  0x11   : > { %2376 = vmatpush1.bf16.msra.mxu0 %v3122_v5  ;;  %v3141_v17 = vld [vmem:[%s4574_s1 + $0x134] ss:$8 sps:$4 sm:$0xff]   ;;  %v3144_v19 = vld [vmem:[%s4574_s1 + $0x24] ss:$8 sps:$4 sm:$0xff]   ;;  %v3143_v20 = vld [vmem:[%s4574_s1 + $0x130] ss:$8 sps:$4 sm:$0xff]  }
  0x12   : > { %2377 = vmatprep.subr.bf16.mxu0 %v3126_v8  ;;  %2417 = vmatpush1.bf16.msra.mxu1 %v3125_v7  ;;  %v3147_v21 = vld [vmem:[%s4574_s1 + $0x124] ss:$8 sps:$4 sm:$0xff]   ;;  %v3146_v22 = vld [vmem:[%s4574_s1 + $0x20] ss:$8 sps:$4 sm:$0xff]   ;;  %v3150_v23 = vld [vmem:[%s4574_s1 + $0x14] ss:$8 sps:$4 sm:$0xff]  }
  0x13   : > { %2418 = vmatprep.subr.bf16.mxu1 %v3129_v10  ;;  %v3149_v24 = vld [vmem:[%s4574_s1 + $0x120] ss:$8 sps:$4 sm:$0xff]   ;;  %v3153_v25 = vld [vmem:[%s4574_s1 + $0x114] ss:$8 sps:$4 sm:$0xff]   ;;  %v3152_v26 = vld [vmem:[%s4574_s1 + $0x10] ss:$8 sps:$4 sm:$0xff]  }
  0x14   : > { %v3156_v27 = vld [vmem:[%s4574_s1 + $0x4] ss:$8 sps:$4 sm:$0xff]   ;;  %v3155_v28 = vld [vmem:[%s4574_s1 + $0x110] ss:$8 sps:$4 sm:$0xff]   ;;  %v3158_v30 = vld [vmem:[%s4574_s1] ss:$8 sps:$4 sm:$0xff]  }
  0x15   : > { %2378 = vmatpush1.bf16.msra.mxu0 %v3128_v9  ;;  %v3159_v29 = vld [vmem:[%s4574_s1 + $0x104] ss:$8 sps:$4 sm:$0xff]   ;;  %v3162_v31 = vld [vmem:[%s4574_s1 + $0xf4] ss:$8 sps:$4 sm:$0xff]   ;;  %v3161_v32 = vld [vmem:[%s4574_s1 + $0x100] ss:$8 sps:$4 sm:$0xff]  }
  0x16   : > { %2379 = vmatprep.subr.bf16.mxu0 %v3132_v11  ;;  %2419 = vmatpush1.bf16.msra.mxu1 %v3131_v12  ;;  %v3165_v33 = vld [vmem:[%s4574_s1 + $0x1f4] ss:$8 sps:$4 sm:$0xff]   ;;  %v3164_v34 = vld [vmem:[%s4574_s1 + $0xf0] ss:$8 sps:$4 sm:$0xff]   ;;  %s4578_s13 = smov (!%p160_p3, %s2818_s13), 1  ;;  %vm427_vm0 = vcmask 1040384  }
  0x17   : > { %2420 = vmatprep.subr.bf16.mxu1 %v3135_v13  ;;  %v3168_v35 = vld [vmem:[%s4574_s1 + $0xe4] ss:$8 sps:$4 sm:$0xff]   ;;  %v3167_v36 = vld [vmem:[%s4574_s1 + $0x1f0] ss:$8 sps:$4 sm:$0xff]   ;;  %v3170_v38 = vld [vmem:[%s4574_s1 + $0xe0] ss:$8 sps:$4 sm:$0xff]  }
  0x18   : > { %v3171_v37 = vld [vmem:[%s4574_s1 + $0x1e4] ss:$8 sps:$4 sm:$0xff]   ;;  %s3104_s17 = smul.u32 1008, %s4578_s13  ;;  %v3174_v39 = vld [vmem:[%s4574_s1 + $0xd4] ss:$8 sps:$4 sm:$0xff]   ;;  %vm644_vm1 = vcmask 261120  }
  0x19   : > { %2380 = vmatpush1.bf16.msra.mxu0 %v3134_v14  ;;  %v3173_v40 = vld [vmem:[%s4574_s1 + $0x1e0] ss:$8 sps:$4 sm:$0xff]   ;;  %v3177_v41 = vld [vmem:[%s4574_s1 + $0x1d4] ss:$8 sps:$4 sm:$0xff]   ;;  %v3176_v42 = vld [vmem:[%s4574_s1 + $0xd0] ss:$8 sps:$4 sm:$0xff]  }
  0x1a   : > { %2381 = vmatprep.subr.bf16.mxu0 %v3138_v15  ;;  %2421 = vmatpush1.bf16.msra.mxu1 %v3137_v16  ;;  %v3179_v43 = vld [vmem:[%s4574_s1 + $0x1d0] ss:$8 sps:$4 sm:$0xff]   ;;  %s3707_s30 = scalar_lea.vmem %s4573_s0, %s3104_s17  ;;  %v3180_v44 = vld [vmem:[%s4574_s1 + $0xc4] ss:$8 sps:$4 sm:$0xff]   ;;  %v3182_v45 = vld [vmem:[%s4574_s1 + $0xc0] ss:$8 sps:$4 sm:$0xff]  }
  0x1b   : > { %2422 = vmatprep.subr.bf16.mxu1 %v3141_v17  ;;  %v3183_v46 = vld [vmem:[%s4574_s1 + $0x1c4] ss:$8 sps:$4 sm:$0xff]   ;;  %v189_v48 = vld [vmem:[%s3707_s30 + $0x98] sm:$0xff]  ;;  %v3185_v49 = vld [vmem:[%s4574_s1 + $0x1c0] ss:$8 sps:$4 sm:$0xff]   ;;  %vm656_vm2 = vcmask 253952  }
  0x1c   : > { %v171_v47 = vld [vmem:[%s3707_s30 + $0x8] sm:$0xff]  ;;  %v225_v51 = vld [vmem:[%s3707_s30 + $0x1b8] sm:$0xff]  ;;  %v315_v53 = vmax.f32 %v189_v48, 0.0  ;;  %v170_v62 = vld [vmem:[%s3707_s30] sm:$0xff]  ;;  %s2824_s14 = sshll.u32 %s4578_s13, 1 }
  0x1d   : > { %2382 = vmatpush1.bf16.msra.mxu0 %v3140_v18  ;;  %v207_v50 = vld [vmem:[%s3707_s30 + $0x128] sm:$0xff]  ;;  %v297_v52 = vmax.f32 %v171_v47, 0.0  ;;  %v3186_v54 = vld [vmem:[%s4574_s1 + $0xb4] ss:$8 sps:$4 sm:$0xff]   ;;  %v3188_v58 = vld [vmem:[%s4574_s1 + $0xb0] ss:$8 sps:$4 sm:$0xff]   ;;  %s168_s17 = scalar_lea.vmem %s4576_s3, %s2824_s14 }
  0x1e   : > { %2383 = vmatprep.subr.bf16.mxu0 %v3144_v19  ;;  %2423 = vmatpush1.bf16.msra.mxu1 %v3143_v20  ;;  %v243_v55 = vld [vmem:[%s3707_s30 + $0x248] sm:$0xff]  ;;  %v333_v57 = vmax.f32 %v207_v50, 0.0  ;;  %v3189_v59 = vld [vmem:[%s4574_s1 + $0x1b4] ss:$8 sps:$4 sm:$0xff]   ;;  %v351_v60 = vmax.f32 %v225_v51, 0.0  ;;  %v206_v3 = vld [vmem:[%s3707_s30 + $0x120] sm:$0xff] }
  0x1f   : > { %2424 = vmatprep.subr.bf16.mxu1 %v3147_v21  ;;  %v279_v56 = vld [vmem:[%s3707_s30 + $0x368] sm:$0x1]  ;;  %v436_v61 = vadd.f32 %v315_v53, %v297_v52  ;;  %v188_v63 = vld [vmem:[%s3707_s30 + $0x90] sm:$0xff]  ;;  %v3192_v0 = vld [vmem:[%s4574_s1 + $0xa4] ss:$8 sps:$4 sm:$0xff]   ;;  %v296_v5 = vmax.f32 %v170_v62, 0.0 }
  0x20   : > { %v261_v1 = vld [vmem:[%s3707_s30 + $0x2d8] sm:$0xff]  ;;  %v405_v2 = vmax.f32 %v279_v56, 0.0  ;;  %v224_v4 = vld [vmem:[%s3707_s30 + $0x1b0] sm:$0xff]  ;;  %v314_v6 = vmax.f32 %v188_v63, 0.0  ;;  %v369_v8 = vmax.f32 %v243_v55, 0.0  ;;  %v242_v10 = vld [vmem:[%s3707_s30 + $0x240] sm:$0xff] }
  0x21   : > { %2384 = vmatpush1.bf16.msra.mxu0 %v3146_v22  ;;  %v3191_v7 = vld [vmem:[%s4574_s1 + $0x1b0] ss:$8 sps:$4 sm:$0xff]   ;;  %v437_v9 = vadd.f32 %v436_v61, %v333_v57  ;;  %v278_v11 = vld [vmem:[%s3707_s30 + $0x360] sm:$0x1]  ;;  %v332_v12 = vmax.f32 %v206_v3, 0.0  ;;  %v350_v13 = vmax.f32 %v224_v4, 0.0 }
  0x22   : > { %2385 = vmatprep.subr.bf16.mxu0 %v3150_v23  ;;  %2425 = vmatpush1.bf16.msra.mxu1 %v3149_v24  ;;  %v422_v14 = vadd.f32 %v314_v6, %v296_v5  ;;  %v173_v15 = vld [vmem:[%s3707_s30 + $0x18] sm:$0xff]  ;;  %v3194_v16 = vld [vmem:[%s4574_s1 + $0xa0] ss:$8 sps:$4 sm:$0xff]   ;;  %v3195_v17 = vld [vmem:[%s4574_s1 + $0x1a4] ss:$8 sps:$4 sm:$0xff]   ;;  %v387_v18 = vmax.f32 %v261_v1, 0.0 }
  0x23   : > { %2426 = vmatprep.subr.bf16.mxu1 %v3153_v25  ;;  %v438_v19 = vadd.f32 %v437_v9, %v351_v60  ;;  %v260_v20 = vld [vmem:[%s3707_s30 + $0x2d0] sm:$0xff]  ;;  %v191_v21 = vld [vmem:[%s3707_s30 + $0xa8] sm:$0xff]  ;;  %v299_v22 = vmax.f32 %v173_v15, 0.0  ;;  %v441_v24 = vsel %vm427_vm0, %v405_v2, 0.0  ;;  %v368_v25 = vmax.f32 %v242_v10, 0.0  ;;  %v262_v3 = vld [vmem:[%s3707_s30 + $0x2e0] sm:$0xff] }
  0x24   : > { %v3198_v23 = vld [vmem:[%s4574_s1 + $0x94] ss:$8 sps:$4 sm:$0xff]   ;;  %v3204_v60 = vld [vmem:[%s4574_s1 + $0x84] ss:$8 sps:$4 sm:$0xff]   ;;  %v280_v63 = vld [vmem:[%s3707_s30 + $0x370] sm:$0x1] }
  0x25   : > { %2386 = vmatpush1.bf16.msra.mxu0 %v3152_v26  ;;  %v423_v26 = vadd.f32 %v422_v14, %v332_v12  ;;  %v3207_v4 = vld [vmem:[%s4574_s1 + $0x184] ss:$8 sps:$4 sm:$0xff]   ;;  %v3206_v9 = vld [vmem:[%s4574_s1 + $0x80] ss:$8 sps:$4 sm:$0xff]   ;;  %v406_v12 = vmax.f32 %v280_v63, 0.0 }
  0x26   : > { %2387 = vmatprep.subr.bf16.mxu0 %v3156_v27  ;;  %2427 = vmatpush1.bf16.msra.mxu1 %v3155_v28  ;;  %v209_v27 = vld [vmem:[%s3707_s30 + $0x138] sm:$0xff]  ;;  %v227_v28 = vld [vmem:[%s3707_s30 + $0x1c8] sm:$0xff] }
  0x27   : > { %2428 = vmatprep.subr.bf16.mxu1 %v3159_v29  ;;  %v317_v29 = vmax.f32 %v191_v21, 0.0  ;;  %v3212_v14 = vld [vmem:[%s4574_s1 + $0x274] ss:$8 sps:$4 sm:$0xff]   ;;  %v3228_v63 = vld [vmem:[%s4574_s1 + $0x240] ss:$8 sps:$4 sm:$0xff]  }
  0x29   : > { %2388 = vmatpush1.bf16.msra.mxu0 %v3158_v30  ;;  %v3197_v30 = vld [vmem:[%s4574_s1 + $0x1a0] ss:$8 sps:$4 sm:$0xff]  }
  0x2a   : > { %2389 = vmatprep.subr.bf16.mxu0 %v3162_v31  ;;  %2429 = vmatpush1.bf16.msra.mxu1 %v3161_v32  ;;  %v439_v31 = vadd.f32 %v438_v19, %v369_v8  ;;  %v404_v32 = vmax.f32 %v278_v11, 0.0  ;;  %v3209_v19 = vld [vmem:[%s4574_s1 + $0x180] ss:$8 sps:$4 sm:$0xff]  }
  0x2b   : > { %2430 = vmatprep.subr.bf16.mxu1 %v3165_v33  ;;  %v245_v33 = vld [vmem:[%s3707_s30 + $0x258] sm:$0xff] }
  0x2c   : > { %v371_v51 = vmax.f32 %v245_v33, 0.0  ;;  %v428_v56 = vsel %vm427_vm0, %v404_v32, 0.0 }
  0x2d   : > { %2390 = vmatpush2.bf16.msra.mxu0 %v3164_v34  ;;  %v263_v34 = vld [vmem:[%s3707_s30 + $0x2e8] sm:$0xff] }
  0x2e   : > { %2391 = vmatprep.subr.bf16.mxu0 %v3168_v35  ;;  %2431 = vmatpush2.bf16.msra.mxu1 %v3167_v36  ;;  %v281_v35 = vld [vmem:[%s3707_s30 + $0x378] sm:$0x1]  ;;  %v335_v36 = vmax.f32 %v209_v27, 0.0  ;;  %v389_v57 = vmax.f32 %v263_v34, 0.0 }
  0x2f   : > { %2432 = vmatprep.subr.bf16.mxu1 %v3171_v37  ;;  %v386_v37 = vmax.f32 %v260_v20, 0.0 }
  0x31   : > { %2392 = vmatpush2.bf16.msra.mxu0 %v3170_v38  ;;  %v424_v38 = vadd.f32 %v423_v26, %v350_v13 }
  0x32   : > { %2393 = vmatprep.subr.bf16.mxu0 %v3174_v39  ;;  %2433 = vmatpush2.bf16.msra.mxu1 %v3173_v40  ;;  %v353_v39 = vmax.f32 %v227_v28, 0.0  ;;  %v462_v40 = vadd.f32 %v317_v29, %v299_v22 }
  0x33   : > { %2434 = vmatprep.subr.bf16.mxu1 %v3177_v41  ;;  %v172_v41 = vld [vmem:[%s3707_s30 + $0x10] sm:$0xff]  ;;  %v425_v50 = vadd.f32 %v424_v38, %v368_v25  ;;  %v454_v25 = vsel %vm427_vm0, %v406_v12, 0.0 }
  0x34   : > { %v298_v47 = vmax.f32 %v172_v41, 0.0  ;;  %v463_v52 = vadd.f32 %v462_v40, %v335_v36  ;;  %v3246_v12 = vld [vmem:[%s4574_s1 + $0x210] ss:$8 sps:$4 sm:$0xff]  }
  0x35   : > { %2394 = vmatpush2.bf16.msra.mxu0 %v3176_v42  ;;  %v190_v42 = vld [vmem:[%s3707_s30 + $0xa0] sm:$0xff]  ;;  %v426_v61 = vadd.f32 %v425_v50, %v386_v37 }
  0x36   : > { %2395 = vmatprep.subr.bf16.mxu0 %v3180_v44  ;;  %2435 = vmatpush2.bf16.msra.mxu1 %v3179_v43  ;;  %v208_v43 = vld [vmem:[%s3707_s30 + $0x130] sm:$0xff]  ;;  %v316_v48 = vmax.f32 %v190_v42, 0.0  ;;  %v464_v62 = vadd.f32 %v463_v52, %v353_v39  ;;  %v3216_v52 = vld [vmem:[%s4574_s1 + $0x260] ss:$8 sps:$4 sm:$0xff]  }
  0x37   : > { %2436 = vmatprep.subr.bf16.mxu1 %v3183_v46  ;;  %v3200_v44 = vld [vmem:[%s4574_s1 + $0x90] ss:$8 sps:$4 sm:$0xff]   ;;  %v226_v46 = vld [vmem:[%s3707_s30 + $0x1c0] sm:$0xff]  ;;  %v334_v53 = vmax.f32 %v208_v43, 0.0  ;;  %v429_v5 = vadd.f32 %v428_v56, %v426_v61 }
  0x38   : > { %v449_v1 = vadd.f32 %v316_v48, %v298_v47  ;;  %v465_v6 = vadd.f32 %v464_v62, %v371_v51  ;;  %v3230_v61 = vld [vmem:[%s4574_s1 + $0x244] ss:$8 sps:$4 sm:$0xff]   ;;  %v3219_v62 = vld [vmem:[%s4574_s1 + $0x360] ss:$8 sps:$4 sm:$0xff]  }
  0x39   : > { %2396 = vmatpush2.bf16.msra.mxu0 %v3182_v45  ;;  %v440_v45 = vadd.f32 %v439_v31, %v387_v18  ;;  %v430_v13 = vrot.slane %v429_v5, 4 }
  0x3a   : > { %2397 = vmatprep.subr.bf16.mxu0 %v3186_v54  ;;  %2437 = vmatpush2.bf16.msra.mxu1 %v3185_v49  ;;  %v3201_v49 = vld [vmem:[%s4574_s1 + $0x194] ss:$8 sps:$4 sm:$0xff]   ;;  %v3203_v54 = vld [vmem:[%s4574_s1 + $0x190] ss:$8 sps:$4 sm:$0xff]   ;;  %v450_v8 = vadd.f32 %v449_v1, %v334_v53  ;;  %v466_v15 = vadd.f32 %v465_v6, %v389_v57  ;;  %v3231_v6 = vld [vmem:[%s4574_s1 + $0x340] ss:$8 sps:$4 sm:$0xff]  }
  0x3b   : > { %2438 = vmatprep.subr.bf16.mxu1 %v3189_v59  ;;  %v442_v55 = vadd.f32 %v441_v24, %v440_v45  ;;  %v244_v59 = vld [vmem:[%s3707_s30 + $0x250] sm:$0xff]  ;;  %v431_v20 = vadd.f32 %v430_v13, %v429_v5  ;;  %v3242_v5 = vld [vmem:[%s4574_s1 + $0x224] ss:$8 sps:$4 sm:$0xff]  }
  0x3c   : > { %v3210_v45 = vld [vmem:[%s4574_s1 + $0x270] ss:$8 sps:$4 sm:$0xff]   ;;  %v3236_v1 = vld [vmem:[%s4574_s1 + $0x234] ss:$8 sps:$4 sm:$0xff]   ;;  %v175_v13 = vld [vmem:[%s3707_s30 + $0x28] sm:$0xff] }
  0x3d   : > { %2398 = vmatpush2.bf16.msra.mxu0 %v3188_v58  ;;  %v407_v58 = vmax.f32 %v281_v35, 0.0  ;;  %v443_v2 = vrot.slane %v442_v55, 4  ;;  %v432_v26 = vrot.slane %v431_v20, 2  ;;  %v3213_v57 = vld [vmem:[%s4574_s1 + $0x370] ss:$8 sps:$4 sm:$0xff]  }
  0x3e   : > { %2399 = vmatprep.subr.bf16.mxu0 %v3192_v0  ;;  %2439 = vmatpush2.bf16.msra.mxu1 %v3191_v7  ;;  %v352_v0 = vmax.f32 %v226_v46, 0.0  ;;  %v370_v7 = vmax.f32 %v244_v59, 0.0 }
  0x3f   : > { %2440 = vmatprep.subr.bf16.mxu1 %v3195_v17  ;;  %v444_v10 = vadd.f32 %v443_v2, %v442_v55  ;;  %v467_v11 = vsel %vm427_vm0, %v407_v58, 0.0  ;;  %v3224_v55 = vld [vmem:[%s4574_s1 + $0x254] ss:$8 sps:$4 sm:$0xff]   ;;  %v3222_v58 = vld [vmem:[%s4574_s1 + $0x250] ss:$8 sps:$4 sm:$0xff]  }
  0x40   : > { %v451_v17 = vadd.f32 %v450_v8, %v352_v0  ;;  %v468_v21 = vadd.f32 %v467_v11, %v466_v15  ;;  %v3227_v0 = vld [vmem:[%s4574_s1 + $0x354] ss:$8 sps:$4 sm:$0xff]   ;;  %v3225_v2 = vld [vmem:[%s4574_s1 + $0x350] ss:$8 sps:$4 sm:$0xff]   ;;  %v3245_v11 = vld [vmem:[%s4574_s1 + $0x324] ss:$8 sps:$4 sm:$0xff]  }
  0x41   : > { %2400 = vmatpush2.bf16.msra.mxu0 %v3194_v16  ;;  %v388_v16 = vmax.f32 %v262_v3, 0.0  ;;  %v445_v18 = vrot.slane %v444_v10, 2  ;;  %v3234_v3 = vld [vmem:[%s4574_s1 + $0x230] ss:$8 sps:$4 sm:$0xff]   ;;  %v3239_v8 = vld [vmem:[%s4574_s1 + $0x334] ss:$8 sps:$4 sm:$0xff]  }
  0x42   : > { %2401 = vmatprep.subr.bf16.mxu0 %v3198_v23  ;;  %2441 = vmatpush2.bf16.msra.mxu1 %v3197_v30  ;;  %v452_v22 = vadd.f32 %v451_v17, %v370_v7  ;;  %v3215_v23 = vld [vmem:[%s4574_s1 + $0x374] ss:$8 sps:$4 sm:$0xff]   ;;  %v469_v27 = vrot.slane %v468_v21, 4  ;;  %v433_v30 = vadd.f32 %v432_v26, %v431_v20  ;;  %v3240_v7 = vld [vmem:[%s4574_s1 + $0x220] ss:$8 sps:$4 sm:$0xff]  }
  0x43   : > { %2442 = vmatprep.subr.bf16.mxu1 %v3201_v49  ;;  %v446_v24 = vadd.f32 %v445_v18, %v444_v10  ;;  %v3218_v49 = vld [vmem:[%s4574_s1 + $0x264] ss:$8 sps:$4 sm:$0xff]   ;;  %v3237_v10 = vld [vmem:[%s4574_s1 + $0x330] ss:$8 sps:$4 sm:$0xff]   ;;  %v301_v18 = vmax.f32 %v175_v13, 0.0 }
  0x44   : > { %v453_v28 = vadd.f32 %v452_v22, %v388_v16  ;;  %v470_v31 = vadd.f32 %v469_v27, %v468_v21  ;;  %v434_v34 = vrot.slane %v433_v30, 1  ;;  %v3254_v15 = vld [vmem:[%s4574_s1 + $0x204] ss:$8 sps:$4 sm:$0xff]   ;;  %v229_v17 = vld [vmem:[%s3707_s30 + $0x1d8] sm:$0xff]  ;;  %v3243_v20 = vld [vmem:[%s4574_s1 + $0x320] ss:$8 sps:$4 sm:$0xff]  }
  0x45   : > { %2402 = vmatpush2.bf16.msra.mxu0 %v3200_v44  ;;  %v447_v29 = vrot.slane %v446_v24, 1  ;;  %v211_v16 = vld [vmem:[%s3707_s30 + $0x148] sm:$0xff]  ;;  %v3260_v26 = vld [vmem:[%s4574_s1 + $0x2f4] ss:$8 sps:$4 sm:$0xff]   ;;  %v355_v27 = vmax.f32 %v229_v17, 0.0 }
  0x46   : > { %2403 = vmatprep.subr.bf16.mxu0 %v3204_v60  ;;  %2443 = vmatpush2.bf16.msra.mxu1 %v3203_v54  ;;  %v455_v32 = vadd.f32 %v454_v25, %v453_v28  ;;  %v471_v35 = vrot.slane %v470_v31, 2  ;;  %v435_v38 = vadd.f32 %v434_v34, %v433_v30  ;;  %v3221_v60 = vld [vmem:[%s4574_s1 + $0x364] ss:$8 sps:$4 sm:$0xff]   ;;  %v3252_v21 = vld [vmem:[%s4574_s1 + $0x200] ss:$8 sps:$4 sm:$0xff]   ;;  %v192_v30 = vld [vmem:[%s3707_s30 + $0xb0] sm:$0xff] }
  0x47   : > { %2444 = vmatprep.subr.bf16.mxu1 %v3207_v4  ;;  %v448_v33 = vadd.f32 %v447_v29, %v446_v24  ;;  %v3233_v4 = vld [vmem:[%s4574_s1 + $0x344] ss:$8 sps:$4 sm:$0xff]   ;;  %v337_v24 = vmax.f32 %v211_v16, 0.0  ;;  %v3251_v25 = vld [vmem:[%s4574_s1 + $0x314] ss:$8 sps:$4 sm:$0xff]  }
  0x48   : > { %v456_v36 = vrot.slane %v455_v32, 4  ;;  %v472_v39 = vadd.f32 %v471_v35, %v470_v31  ;;  %v666_v42 = vmul.f32 0.020408163, %v435_v38  ;;  %v247_v22 = vld [vmem:[%s3707_s30 + $0x268] sm:$0xff]  ;;  %v174_v29 = vld [vmem:[%s3707_s30 + $0x20] sm:$0xff]  ;;  %v318_v35 = vmax.f32 %v192_v30, 0.0 }
  0x49   : > { %2404 = vmatpush2.bf16.msra.mxu0 %v3206_v9  ;;  %v667_v37 = vmul.f32 0.020408163, %v448_v33  ;;  %v3248_v9 = vld [vmem:[%s4574_s1 + $0x214] ss:$8 sps:$4 sm:$0xff]   ;;  %v210_v31 = vld [vmem:[%s3707_s30 + $0x140] sm:$0xff]  ;;  %v300_v34 = vmax.f32 %v174_v29, 0.0 }
  0x4a   : > { %2455 = vmatprep.subr.bf16.mxu0 %v3212_v14  ;;  %2445 = vmatpush2.bf16.msra.mxu1 %v3209_v19  ;;  %v457_v40 = vadd.f32 %v456_v36, %v455_v32  ;;  %v473_v43 = vrot.slane %v472_v39, 1  ;;  %v684_v46 = vpack.c.bf16 %v666_v42, %v666_v42  ;;  %v193_v14 = vld [vmem:[%s3707_s30 + $0xb8] sm:$0xff]  ;;  %v228_v33 = vld [vmem:[%s3707_s30 + $0x1d0] sm:$0xff]  ;;  %v336_v36 = vmax.f32 %v210_v31, 0.0 }
  0x4b   : > { %2496 = vmatprep.subr.bf16.mxu1 %v3215_v23  ;;  %v685_v41 = vpack.c.bf16 %v667_v37, %v667_v37  ;;  %v319_v19 = vmax.f32 %v193_v14, 0.0  ;;  %v283_v23 = vld [vmem:[%s3707_s30 + $0x388] sm:$0x1]  ;;  %v265_v32 = vld [vmem:[%s3707_s30 + $0x2f8] sm:$0xff]  ;;  %v373_v37 = vmax.f32 %v247_v22, 0.0  ;;  %v230_v14 = vld [vmem:[%s3707_s30 + $0x1e0] sm:$0xff] }
  0x4c   : > { %v458_v44 = vrot.slane %v457_v40, 2  ;;  %v474_v47 = vadd.f32 %v473_v43, %v472_v39  ;;  %v409_v38 = vmax.f32 %v283_v23, 0.0  ;;  %v3249_v42 = vld [vmem:[%s4574_s1 + $0x310] ss:$8 sps:$4 sm:$0xff]   ;;  %v282_v43 = vld [vmem:[%s3707_s30 + $0x380] sm:$0x1] }
  0x4d   : > { %2405 = vmatprep.mubr.bf16.mxu0 %v685_v41  ;;  %v488_v28 = vadd.f32 %v319_v19, %v301_v18  ;;  %v264_v41 = vld [vmem:[%s3707_s30 + $0x2f0] sm:$0xff]  ;;  %v356_v30 = vmax.f32 %v230_v14, 0.0 }
  0x4e   : > { %v459_v48 = vadd.f32 %v458_v44, %v457_v40  ;;  %2406 = vmatmul.mubr.bf16.vlgmr.msra.gmra.mxu0 %v684_v46  ;;  %v669_v50 = vmul.f32 0.020408163, %v474_v47  ;;  %v246_v40 = vld [vmem:[%s3707_s30 + $0x260] sm:$0xff]  ;;  %v354_v44 = vmax.f32 %v228_v33, 0.0  ;;  %v177_v46 = vld [vmem:[%s3707_s30 + $0x38] sm:$0xff] }
  0x4f   : > { %2456 = vmatpush1.bf16.msra.mxu0 %v3210_v45  ;;  %v489_v39 = vadd.f32 %v488_v28, %v337_v24  ;;  %v475_v45 = vadd.f32 %v318_v35, %v300_v34  ;;  %v3257_v47 = vld [vmem:[%s4574_s1 + $0x304] ss:$8 sps:$4 sm:$0xff]   ;;  %v3272_v16 = vld [vmem:[%s4574_s1 + $0x2d4] ss:$8 sps:$4 sm:$0xff]   ;;  %v284_v29 = vld [vmem:[%s3707_s30 + $0x390] sm:$0x1] }
  0x50   : > { %v460_v51 = vrot.slane %v459_v48, 1  ;;  %v687_v53 = vpack.c.bf16 %v669_v50, %v669_v50  ;;  %2457 = vmatprep.subr.bf16.mxu0 %v3218_v49  ;;  %v391_v49 = vmax.f32 %v265_v32, 0.0  ;;  %v3269_v32 = vld [vmem:[%s4574_s1 + $0x3e4] ss:$8 sps:$4 sm:$0xff]   ;;  %v3270_v35 = vld [vmem:[%s4574_s1 + $0x2d0] ss:$8 sps:$4 sm:$0xff]  }
  0x51   : > { %v490_v50 = vadd.f32 %v489_v39, %v355_v27  ;;  %v266_v34 = vld [vmem:[%s3707_s30 + $0x300] sm:$0xff]  ;;  %v3287_v14 = vld [vmem:[%s4574_s1 + $0x3b4] ss:$8 sps:$4 sm:$0xff]  }
  0x52   : > { %v461_v54 = vadd.f32 %v460_v51, %v459_v48  ;;  %2446 = vmatprep.mubr.bf16.mxu1 %v687_v53  ;;  %v3258_v48 = vld [vmem:[%s4574_s1 + $0x2f0] ss:$8 sps:$4 sm:$0xff]   ;;  %v195_v51 = vld [vmem:[%s3707_s30 + $0xc8] sm:$0xff]  ;;  %v303_v53 = vmax.f32 %v177_v46, 0.0  ;;  %v392_v46 = vmax.f32 %v266_v34, 0.0 }
  0x53   : > { %2458 = vmatpush1.bf16.msra.mxu0 %v3216_v52  ;;  %v213_v52 = vld [vmem:[%s3707_s30 + $0x158] sm:$0xff] }
  0x54   : > { %v668_v56 = vmul.f32 0.020408163, %v461_v54  ;;  %2459 = vmatprep.subr.bf16.mxu0 %v3224_v55  ;;  %v3266_v54 = vld [vmem:[%s4574_s1 + $0x2e4] ss:$8 sps:$4 sm:$0xff]   ;;  %v372_v55 = vmax.f32 %v246_v40, 0.0 }
  0x55   : > { %v3278_v40 = vld [vmem:[%s4574_s1 + $0x2c4] ss:$8 sps:$4 sm:$0xff]   ;;  %v3297_v34 = vld [vmem:[%s4574_s1 + $0x390] ss:$8 sps:$4 sm:$0xff]  }
  0x56   : > { %v686_v59 = vpack.c.bf16 %v668_v56, %v668_v56  ;;  %v476_v56 = vadd.f32 %v475_v45, %v336_v36 }
  0x57   : > { %2460 = vmatpush1.bf16.msra.mxu0 %v3222_v58  ;;  %v321_v58 = vmax.f32 %v195_v51, 0.0 }
  0x58   : > { %2447 = vmatmul.mubr.bf16.vlgmr.msra.gmra.mxu1 %v686_v59  ;;  %2461 = vmatprep.subr.bf16.mxu0 %v3230_v61  ;;  %v339_v59 = vmax.f32 %v213_v52, 0.0  ;;  %v493_v61 = vsel %vm427_vm0, %v409_v38, 0.0 }
  0x59   : > { %2497 = vmatpush1.bf16.msra.mxu1 %v3213_v57  ;;  %v231_v57 = vld [vmem:[%s3707_s30 + $0x1e8] sm:$0xff] }
  0x5a   : > { %2498 = vmatprep.subr.bf16.mxu1 %v3221_v60  ;;  %v491_v60 = vadd.f32 %v490_v50, %v373_v37  ;;  %v3276_v50 = vld [vmem:[%s4574_s1 + $0x2c0] ss:$8 sps:$4 sm:$0xff]  }
  0x5b   : > { %2462 = vmatpush1.bf16.msra.mxu0 %v3228_v63  ;;  %v408_v63 = vmax.f32 %v282_v43, 0.0  ;;  %v410_v43 = vmax.f32 %v284_v29, 0.0 }
  0x5c   : > { %2463 = vmatprep.subr.bf16.mxu0 %v3236_v1  ;;  %v267_v1 = vld [vmem:[%s3707_s30 + $0x308] sm:$0xff]  ;;  %v492_v13 = vadd.f32 %v491_v60, %v391_v49 }
  0x5d   : > { %2499 = vmatpush1.bf16.msra.mxu1 %v3219_v62  ;;  %v390_v62 = vmax.f32 %v264_v41, 0.0  ;;  %v480_v22 = vsel %vm427_vm0, %v408_v63, 0.0  ;;  %v393_v23 = vmax.f32 %v267_v1, 0.0  ;;  %v3282_v63 = vld [vmem:[%s4574_s1 + $0x2b0] ss:$8 sps:$4 sm:$0xff]  }
  0x5e   : > { %2500 = vmatprep.subr.bf16.mxu1 %v3227_v0  ;;  %v249_v0 = vld [vmem:[%s3707_s30 + $0x278] sm:$0xff] }
  0x5f   : > { %2464 = vmatpush1.bf16.msra.mxu0 %v3234_v3  ;;  %v3255_v3 = vld [vmem:[%s4574_s1 + $0x300] ss:$8 sps:$4 sm:$0xff]   ;;  %v375_v18 = vmax.f32 %v249_v0, 0.0 }
  0x60   : > { %2465 = vmatprep.subr.bf16.mxu0 %v3242_v5  ;;  %v285_v5 = vld [vmem:[%s3707_s30 + $0x398] sm:$0x1] }
  0x61   : > { %2501 = vmatpush1.bf16.msra.mxu1 %v3225_v2  ;;  %v176_v2 = vld [vmem:[%s3707_s30 + $0x30] sm:$0xff]  ;;  %v411_v24 = vmax.f32 %v285_v5, 0.0 }
  0x62   : > { %2502 = vmatprep.subr.bf16.mxu1 %v3233_v4  ;;  %v477_v4 = vadd.f32 %v476_v56, %v354_v44 }
  0x63   : > { %2466 = vmatpush1.bf16.msra.mxu0 %v3240_v7  ;;  %v514_v7 = vadd.f32 %v321_v58, %v303_v53 }
  0x64   : > { %2467 = vmatprep.subr.bf16.mxu0 %v3248_v9  ;;  %v212_v9 = vld [vmem:[%s3707_s30 + $0x150] sm:$0xff]  ;;  %v478_v17 = vadd.f32 %v477_v4, %v372_v55  ;;  %v3290_v4 = vld [vmem:[%s4574_s1 + $0x2a4] ss:$8 sps:$4 sm:$0xff]  }
  0x65   : > { %2503 = vmatpush1.bf16.msra.mxu1 %v3231_v6  ;;  %v357_v6 = vmax.f32 %v231_v57, 0.0  ;;  %v515_v19 = vadd.f32 %v514_v7, %v339_v59  ;;  %v3284_v55 = vld [vmem:[%s4574_s1 + $0x2b4] ss:$8 sps:$4 sm:$0xff]   ;;  %v506_v57 = vsel %vm427_vm0, %v410_v43, 0.0 }
  0x66   : > { %2504 = vmatprep.subr.bf16.mxu1 %v3239_v8  ;;  %v194_v8 = vld [vmem:[%s3707_s30 + $0xc0] sm:$0xff]  ;;  %v479_v27 = vadd.f32 %v478_v17, %v390_v62  ;;  %v3311_v43 = vld [vmem:[%s4574_s1 + $0x574] ss:$8 sps:$4 sm:$0xff]  }
  0x67   : > { %2468 = vmatpush1.bf16.msra.mxu0 %v3246_v12  ;;  %v3264_v12 = vld [vmem:[%s4574_s1 + $0x2e0] ss:$8 sps:$4 sm:$0xff]   ;;  %v516_v28 = vadd.f32 %v515_v19, %v357_v6  ;;  %v3285_v19 = vld [vmem:[%s4574_s1 + $0x3b0] ss:$8 sps:$4 sm:$0xff]  }
  0x68   : > { %2469 = vmatprep.subr.bf16.mxu0 %v3254_v15  ;;  %v320_v15 = vmax.f32 %v194_v8, 0.0  ;;  %v481_v36 = vadd.f32 %v480_v22, %v479_v27  ;;  %v3294_v22 = vld [vmem:[%s4574_s1 + $0x290] ss:$8 sps:$4 sm:$0xff]  }
  0x69   : > { %2505 = vmatpush1.bf16.msra.mxu1 %v3237_v10  ;;  %v302_v10 = vmax.f32 %v176_v2, 0.0  ;;  %v517_v37 = vadd.f32 %v516_v28, %v375_v18  ;;  %v3299_v28 = vld [vmem:[%s4574_s1 + $0x394] ss:$8 sps:$4 sm:$0xff]  }
  0x6a   : > { %2506 = vmatprep.subr.bf16.mxu1 %v3245_v11  ;;  %v3263_v11 = vld [vmem:[%s4574_s1 + $0x3f4] ss:$8 sps:$4 sm:$0xff]   ;;  %v482_v44 = vrot.slane %v481_v36, 4 }
  0x6b   : > { %2470 = vmatpush1.bf16.msra.mxu0 %v3252_v21  ;;  %v494_v21 = vadd.f32 %v493_v61, %v492_v13  ;;  %v501_v31 = vadd.f32 %v320_v15, %v302_v10  ;;  %v518_v45 = vadd.f32 %v517_v37, %v393_v23  ;;  %v3273_v61 = vld [vmem:[%s4574_s1 + $0x3d0] ss:$8 sps:$4 sm:$0xff]   ;;  %v3279_v10 = vld [vmem:[%s4574_s1 + $0x3c0] ss:$8 sps:$4 sm:$0xff]   ;;  %v3296_v15 = vld [vmem:[%s4574_s1 + $0x294] ss:$8 sps:$4 sm:$0xff]  }
  0x6c   : > { %2471 = vmatprep.subr.bf16.mxu0 %v3260_v26  ;;  %v3261_v26 = vld [vmem:[%s4574_s1 + $0x3f0] ss:$8 sps:$4 sm:$0xff]   ;;  %v483_v51 = vadd.f32 %v482_v44, %v481_v36  ;;  %v3320_v44 = vld [vmem:[%s4574_s1 + $0x454] ss:$8 sps:$4 sm:$0xff]  }
  0x6d   : > { %2507 = vmatpush1.bf16.msra.mxu1 %v3243_v20  ;;  %v338_v20 = vmax.f32 %v212_v9, 0.0  ;;  %v495_v33 = vrot.slane %v494_v21, 4  ;;  %v3306_v37 = vld [vmem:[%s4574_s1 + $0x470] ss:$8 sps:$4 sm:$0xff]  }
  0x6e   : > { %2508 = vmatprep.subr.bf16.mxu1 %v3251_v25  ;;  %v248_v25 = vld [vmem:[%s3707_s30 + $0x270] sm:$0xff]  ;;  %v484_v58 = vrot.slane %v483_v51, 2 }
  0x6f   : > { %2472 = vmatpush2.bf16.msra.mxu0 %v3258_v48  ;;  %v374_v38 = vmax.f32 %v248_v25, 0.0  ;;  %v502_v39 = vadd.f32 %v501_v31, %v338_v20  ;;  %v496_v41 = vadd.f32 %v495_v33, %v494_v21  ;;  %v3267_v48 = vld [vmem:[%s4574_s1 + $0x3e0] ss:$8 sps:$4 sm:$0xff]   ;;  %v3293_v21 = vld [vmem:[%s4574_s1 + $0x3a4] ss:$8 sps:$4 sm:$0xff]  }
  0x70   : > { %2473 = vmatprep.subr.bf16.mxu0 %v3266_v54  ;;  %v3275_v54 = vld [vmem:[%s4574_s1 + $0x3d4] ss:$8 sps:$4 sm:$0xff]   ;;  %v485_v0 = vadd.f32 %v484_v58, %v483_v51  ;;  %v3302_v25 = vld [vmem:[%s4574_s1 + $0x284] ss:$8 sps:$4 sm:$0xff]   ;;  %v3300_v31 = vld [vmem:[%s4574_s1 + $0x280] ss:$8 sps:$4 sm:$0xff]  }
  0x71   : > { %2509 = vmatpush1.bf16.msra.mxu1 %v3249_v42  ;;  %v519_v42 = vsel %vm427_vm0, %v411_v24, 0.0  ;;  %v497_v49 = vrot.slane %v496_v41, 2  ;;  %v3308_v33 = vld [vmem:[%s4574_s1 + $0x474] ss:$8 sps:$4 sm:$0xff]   ;;  %v3324_v51 = vld [vmem:[%s4574_s1 + $0x440] ss:$8 sps:$4 sm:$0xff]  }
  0x72   : > { %2510 = vmatprep.subr.bf16.mxu1 %v3257_v47  ;;  %v503_v47 = vadd.f32 %v502_v39, %v356_v30  ;;  %v520_v52 = vadd.f32 %v519_v42, %v518_v45  ;;  %v486_v9 = vrot.slane %v485_v0, 1  ;;  %v3314_v39 = vld [vmem:[%s4574_s1 + $0x464] ss:$8 sps:$4 sm:$0xff]   ;;  %v3312_v42 = vld [vmem:[%s4574_s1 + $0x460] ss:$8 sps:$4 sm:$0xff]   ;;  %v197_v58 = vld [vmem:[%s3707_s30 + $0xd8] sm:$0xff] }
  0x73   : > { %2474 = vmatpush2.bf16.msra.mxu0 %v3264_v12  ;;  %v498_v56 = vadd.f32 %v497_v49, %v496_v41  ;;  %v3326_v49 = vld [vmem:[%s4574_s1 + $0x444] ss:$8 sps:$4 sm:$0xff]  }
  0x74   : > { %2475 = vmatprep.subr.bf16.mxu0 %v3272_v16  ;;  %v504_v53 = vadd.f32 %v503_v47, %v374_v38  ;;  %v521_v59 = vrot.slane %v520_v52, 4  ;;  %v487_v20 = vadd.f32 %v486_v9, %v485_v0  ;;  %v3305_v38 = vld [vmem:[%s4574_s1 + $0x384] ss:$8 sps:$4 sm:$0xff]   ;;  %v3318_v47 = vld [vmem:[%s4574_s1 + $0x450] ss:$8 sps:$4 sm:$0xff]  }
  0x75   : > { %2511 = vmatpush1.bf16.msra.mxu1 %v3255_v3  ;;  %v499_v62 = vrot.slane %v498_v56, 1  ;;  %v3281_v3 = vld [vmem:[%s4574_s1 + $0x3c4] ss:$8 sps:$4 sm:$0xff]   ;;  %v232_v9 = vld [vmem:[%s3707_s30 + $0x1f0] sm:$0xff] }
  0x76   : > { %2512 = vmatprep.subr.bf16.mxu1 %v3263_v11  ;;  %v505_v60 = vadd.f32 %v504_v53, %v392_v46  ;;  %v522_v1 = vadd.f32 %v521_v59, %v520_v52  ;;  %v3288_v11 = vld [vmem:[%s4574_s1 + $0x2a0] ss:$8 sps:$4 sm:$0xff]   ;;  %v670_v29 = vmul.f32 0.020408163, %v487_v20  ;;  %v3309_v46 = vld [vmem:[%s4574_s1 + $0x570] ss:$8 sps:$4 sm:$0xff]  }
  0x77   : > { %2476 = vmatpush2.bf16.msra.mxu0 %v3270_v35  ;;  %v500_v5 = vadd.f32 %v499_v62, %v498_v56  ;;  %v3323_v52 = vld [vmem:[%s4574_s1 + $0x554] ss:$8 sps:$4 sm:$0xff]   ;;  %v3329_v56 = vld [vmem:[%s4574_s1 + $0x544] ss:$8 sps:$4 sm:$0xff]  }
  0x78   : > { %2477 = vmatprep.subr.bf16.mxu0 %v3278_v40  ;;  %v507_v2 = vadd.f32 %v506_v57, %v505_v60  ;;  %v523_v6 = vrot.slane %v522_v1, 2  ;;  %v688_v35 = vpack.c.bf16 %v670_v29, %v670_v29  ;;  %v3303_v40 = vld [vmem:[%s4574_s1 + $0x380] ss:$8 sps:$4 sm:$0xff]   ;;  %v3332_v53 = vld [vmem:[%s4574_s1 + $0x434] ss:$8 sps:$4 sm:$0xff]  }
  0x79   : > { %2513 = vmatpush2.bf16.msra.mxu1 %v3261_v26  ;;  %v671_v8 = vmul.f32 0.020408163, %v500_v5  ;;  %v3291_v26 = vld [vmem:[%s4574_s1 + $0x3a0] ss:$8 sps:$4 sm:$0xff]   ;;  %v3338_v60 = vld [vmem:[%s4574_s1 + $0x424] ss:$8 sps:$4 sm:$0xff]  }
  0x7a   : > { %2514 = vmatprep.subr.bf16.mxu1 %v3269_v32  ;;  %v508_v7 = vrot.slane %v507_v2, 4  ;;  %v524_v12 = vadd.f32 %v523_v6, %v522_v1  ;;  %v179_v57 = vld [vmem:[%s3707_s30 + $0x48] sm:$0xff]  ;;  %v181_v20 = vld [vmem:[%s3707_s30 + $0x58] sm:$0xff] }
  0x7b   : > { %2478 = vmatpush2.bf16.msra.mxu0 %v3276_v50  ;;  %v689_v16 = vpack.c.bf16 %v671_v8, %v671_v8  ;;  %v3315_v50 = vld [vmem:[%s4574_s1 + $0x560] ss:$8 sps:$4 sm:$0xff]   ;;  %v305_v62 = vmax.f32 %v179_v57, 0.0 }
  0x7c   : > { %2479 = vmatprep.subr.bf16.mxu0 %v3284_v55  ;;  %v509_v13 = vadd.f32 %v508_v7, %v507_v2  ;;  %v525_v17 = vrot.slane %v524_v12, 1  ;;  %v3330_v55 = vld [vmem:[%s4574_s1 + $0x430] ss:$8 sps:$4 sm:$0xff]   ;;  %v215_v59 = vld [vmem:[%s3707_s30 + $0x168] sm:$0xff]  ;;  %v214_v8 = vld [vmem:[%s3707_s30 + $0x160] sm:$0xff] }
  0x7d   : > { %2515 = vmatpush2.bf16.msra.mxu1 %v3267_v48  ;;  %2487 = vmatprep.mubr.bf16.mxu0 %v689_v16  ;;  %v3317_v48 = vld [vmem:[%s4574_s1 + $0x564] ss:$8 sps:$4 sm:$0xff]   ;;  %v341_v0 = vmax.f32 %v215_v59, 0.0  ;;  %v287_v2 = vld [vmem:[%s3707_s30 + $0x3a8] sm:$0x1]  ;;  %v196_v7 = vld [vmem:[%s3707_s30 + $0xd0] sm:$0xff] }
  0x7e   : > { %2516 = vmatprep.subr.bf16.mxu1 %v3275_v54  ;;  %v510_v18 = vrot.slane %v509_v13, 2  ;;  %v526_v23 = vadd.f32 %v525_v17, %v524_v12  ;;  %v3321_v54 = vld [vmem:[%s4574_s1 + $0x550] ss:$8 sps:$4 sm:$0xff]   ;;  %v251_v1 = vld [vmem:[%s3707_s30 + $0x288] sm:$0xff]  ;;  %v340_v16 = vmax.f32 %v214_v8, 0.0 }
  0x7f   : > { %2480 = vmatpush2.bf16.msra.mxu0 %v3282_v63  ;;  %v323_v63 = vmax.f32 %v197_v58, 0.0  ;;  %v3336_v12 = vld [vmem:[%s4574_s1 + $0x420] ss:$8 sps:$4 sm:$0xff]   ;;  %v377_v17 = vmax.f32 %v251_v1, 0.0  ;;  %v3347_v58 = vld [vmem:[%s4574_s1 + $0x514] ss:$8 sps:$4 sm:$0xff]  }
  0x80   : > { %2481 = vmatprep.subr.bf16.mxu0 %v3290_v4  ;;  %v511_v24 = vadd.f32 %v510_v18, %v509_v13  ;;  %v673_v27 = vmul.f32 0.020408163, %v526_v23  ;;  %v3327_v4 = vld [vmem:[%s4574_s1 + $0x540] ss:$8 sps:$4 sm:$0xff]   ;;  %v269_v13 = vld [vmem:[%s3707_s30 + $0x318] sm:$0xff]  ;;  %v413_v18 = vmax.f32 %v287_v2, 0.0 }
  0x81   : > { %2517 = vmatpush2.bf16.msra.mxu1 %v3273_v61  ;;  %v233_v61 = vld [vmem:[%s3707_s30 + $0x1f8] sm:$0xff]  ;;  %v540_v6 = vadd.f32 %v323_v63, %v305_v62  ;;  %v286_v23 = vld [vmem:[%s3707_s30 + $0x3a0] sm:$0x1]  ;;  %v288_v8 = vld [vmem:[%s3707_s30 + $0x3b0] sm:$0x1] }
  0x82   : > { %2518 = vmatprep.subr.bf16.mxu1 %v3281_v3  ;;  %v512_v30 = vrot.slane %v511_v24, 1  ;;  %v691_v32 = vpack.c.bf16 %v673_v27, %v673_v27  ;;  %v178_v3 = vld [vmem:[%s3707_s30 + $0x40] sm:$0xff]  ;;  %v359_v5 = vmax.f32 %v233_v61, 0.0  ;;  %v3342_v27 = vld [vmem:[%s4574_s1 + $0x410] ss:$8 sps:$4 sm:$0xff]  }
  0x83   : > { %2482 = vmatpush2.bf16.msra.mxu0 %v3288_v11  ;;  %v3335_v11 = vld [vmem:[%s4574_s1 + $0x534] ss:$8 sps:$4 sm:$0xff]   ;;  %v3348_v59 = vld [vmem:[%s4574_s1 + $0x400] ss:$8 sps:$4 sm:$0xff]  }
  0x84   : > { %2483 = vmatprep.subr.bf16.mxu0 %v3296_v15  ;;  %2528 = vmatprep.mubr.bf16.mxu1 %v691_v32  ;;  %v513_v36 = vadd.f32 %v512_v30, %v511_v24  ;;  %v322_v15 = vmax.f32 %v196_v7, 0.0  ;;  %v358_v24 = vmax.f32 %v232_v9, 0.0  ;;  %v199_v30 = vld [vmem:[%s3707_s30 + $0xe8] sm:$0xff] }
  0x85   : > { %2519 = vmatpush2.bf16.msra.mxu1 %v3279_v10  ;;  %v304_v10 = vmax.f32 %v178_v3, 0.0  ;;  %v235_v32 = vld [vmem:[%s3707_s30 + $0x208] sm:$0xff] }
  0x86   : > { %2520 = vmatprep.subr.bf16.mxu1 %v3287_v14  ;;  %v672_v41 = vmul.f32 0.020408163, %v513_v36  ;;  %v250_v14 = vld [vmem:[%s3707_s30 + $0x280] sm:$0xff] }
  0x87   : > { %2484 = vmatpush2.bf16.msra.mxu0 %v3294_v22  ;;  %v268_v22 = vld [vmem:[%s3707_s30 + $0x310] sm:$0xff]  ;;  %v376_v36 = vmax.f32 %v250_v14, 0.0 }
  0x88   : > { %2485 = vmatprep.subr.bf16.mxu0 %v3302_v25  ;;  %v690_v45 = vpack.c.bf16 %v672_v41, %v672_v41  ;;  %v527_v25 = vadd.f32 %v322_v15, %v304_v10  ;;  %v545_v41 = vsel %vm427_vm0, %v413_v18, 0.0  ;;  %v3354_v18 = vld [vmem:[%s4574_s1 + $0x4f0] ss:$8 sps:$4 sm:$0xff]  }
  0x89   : > { %2521 = vmatpush2.bf16.msra.mxu1 %v3285_v19  ;;  %v541_v19 = vadd.f32 %v540_v6, %v341_v0 }
  0x8a   : > { %2522 = vmatprep.subr.bf16.mxu1 %v3293_v21  ;;  %v3344_v21 = vld [vmem:[%s4574_s1 + $0x414] ss:$8 sps:$4 sm:$0xff]  }
  0x8b   : > { %2486 = vmatpush2.bf16.msra.mxu0 %v3300_v31  ;;  %v542_v29 = vadd.f32 %v541_v19, %v359_v5  ;;  %v217_v31 = vld [vmem:[%s3707_s30 + $0x178] sm:$0xff] }
  0x8c   : > { %2537 = vmatprep.subr.bf16.mxu0 %v3308_v33  ;;  %v307_v33 = vmax.f32 %v181_v20, 0.0  ;;  %v3356_v5 = vld [vmem:[%s4574_s1 + $0x4f4] ss:$8 sps:$4 sm:$0xff]  }
  0x8d   : > { %2523 = vmatpush2.bf16.msra.mxu1 %v3291_v26  ;;  %v3333_v26 = vld [vmem:[%s4574_s1 + $0x530] ss:$8 sps:$4 sm:$0xff]  }
  0x8e   : > { %2524 = vmatprep.subr.bf16.mxu1 %v3299_v28  ;;  %2488 = vmatmul.mubr.bf16.vlgmr.msra.gmra.mxu0 %v688_v35  ;;  %v395_v28 = vmax.f32 %v269_v13, 0.0  ;;  %v3350_v35 = vld [vmem:[%s4574_s1 + $0x404] ss:$8 sps:$4 sm:$0xff]   ;;  %v3345_v13 = vld [vmem:[%s4574_s1 + $0x510] ss:$8 sps:$4 sm:$0xff]  }
  0x8f   : > { %2538 = vmatpush1.bf16.msra.mxu0 %v3306_v37  ;;  %v528_v37 = vadd.f32 %v527_v25, %v340_v16 }
  0x90   : > { %2539 = vmatprep.subr.bf16.mxu0 %v3314_v39  ;;  %v325_v39 = vmax.f32 %v199_v30, 0.0 }
  0x91   : > { %2525 = vmatpush2.bf16.msra.mxu1 %v3297_v34  ;;  %v3341_v34 = vld [vmem:[%s4574_s1 + $0x524] ss:$8 sps:$4 sm:$0xff]  }
  0x92   : > { %2526 = vmatprep.subr.bf16.mxu1 %v3305_v38  ;;  %v253_v38 = vld [vmem:[%s3707_s30 + $0x298] sm:$0xff] }
  0x93   : > { %2540 = vmatpush1.bf16.msra.mxu0 %v3312_v42  ;;  %v412_v42 = vmax.f32 %v286_v23, 0.0  ;;  %v379_v61 = vmax.f32 %v253_v38, 0.0  ;;  %v3362_v23 = vld [vmem:[%s4574_s1 + $0x4e4] ss:$8 sps:$4 sm:$0xff]  }
  0x94   : > { %2541 = vmatprep.subr.bf16.mxu0 %v3320_v44  ;;  %v180_v44 = vld [vmem:[%s3707_s30 + $0x50] sm:$0xff] }
  0x95   : > { %2527 = vmatpush2.bf16.msra.mxu1 %v3303_v40  ;;  %v543_v40 = vadd.f32 %v542_v29, %v377_v17  ;;  %v532_v1 = vsel %vm427_vm0, %v412_v42, 0.0 }
  0x96   : > { %2578 = vmatprep.subr.bf16.mxu1 %v3311_v43  ;;  %v343_v43 = vmax.f32 %v217_v31, 0.0 }
  0x97   : > { %2542 = vmatpush1.bf16.msra.mxu0 %v3318_v47  ;;  %v394_v47 = vmax.f32 %v268_v22, 0.0  ;;  %v3353_v22 = vld [vmem:[%s4574_s1 + $0x504] ss:$8 sps:$4 sm:$0xff]  }
  0x98   : > { %2529 = vmatmul.mubr.bf16.vlgmr.msra.gmra.mxu1 %v690_v45  ;;  %2543 = vmatprep.subr.bf16.mxu0 %v3326_v49  ;;  %v198_v45 = vld [vmem:[%s3707_s30 + $0xe0] sm:$0xff]  ;;  %v271_v49 = vld [vmem:[%s3707_s30 + $0x328] sm:$0xff] }
  0x99   : > { %2579 = vmatpush1.bf16.msra.mxu1 %v3309_v46  ;;  %v216_v46 = vld [vmem:[%s3707_s30 + $0x170] sm:$0xff]  ;;  %v324_v57 = vmax.f32 %v198_v45, 0.0  ;;  %v397_v2 = vmax.f32 %v271_v49, 0.0 }
  0x9a   : > { %2580 = vmatprep.subr.bf16.mxu1 %v3317_v48  ;;  %v529_v48 = vadd.f32 %v528_v37, %v358_v24  ;;  %v342_v63 = vmax.f32 %v216_v46, 0.0  ;;  %v3365_v46 = vld [vmem:[%s4574_s1 + $0x5e4] ss:$8 sps:$4 sm:$0xff]  }
  0x9b   : > { %2544 = vmatpush1.bf16.msra.mxu0 %v3324_v51  ;;  %v361_v51 = vmax.f32 %v235_v32, 0.0  ;;  %v3360_v32 = vld [vmem:[%s4574_s1 + $0x4e0] ss:$8 sps:$4 sm:$0xff]  }
  0x9c   : > { %2545 = vmatprep.subr.bf16.mxu0 %v3332_v53  ;;  %v3339_v53 = vld [vmem:[%s4574_s1 + $0x520] ss:$8 sps:$4 sm:$0xff]  }
  0x9d   : > { %2581 = vmatpush1.bf16.msra.mxu1 %v3315_v50  ;;  %v289_v50 = vld [vmem:[%s3707_s30 + $0x3b8] sm:$0x1] }
  0x9e   : > { %2582 = vmatprep.subr.bf16.mxu1 %v3323_v52  ;;  %v566_v52 = vadd.f32 %v325_v39, %v307_v33  ;;  %v415_v3 = vmax.f32 %v289_v50, 0.0  ;;  %v3363_v50 = vld [vmem:[%s4574_s1 + $0x5e0] ss:$8 sps:$4 sm:$0xff]  }
  0x9f   : > { %2546 = vmatpush1.bf16.msra.mxu0 %v3330_v55  ;;  %v234_v55 = vld [vmem:[%s3707_s30 + $0x200] sm:$0xff] }
  0xa0   : > { %2547 = vmatprep.subr.bf16.mxu0 %v3338_v60  ;;  %v530_v60 = vadd.f32 %v529_v48, %v376_v36  ;;  %v567_v62 = vadd.f32 %v566_v52, %v343_v43  ;;  %v360_v9 = vmax.f32 %v234_v55, 0.0  ;;  %v571_v20 = vsel %vm427_vm0, %v415_v3, 0.0  ;;  %v3368_v36 = vld [vmem:[%s4574_s1 + $0x4d4] ss:$8 sps:$4 sm:$0xff]   ;;  %v3357_v43 = vld [vmem:[%s4574_s1 + $0x5f0] ss:$8 sps:$4 sm:$0xff]  }
  0xa1   : > { %2583 = vmatpush1.bf16.msra.mxu1 %v3321_v54  ;;  %v544_v54 = vadd.f32 %v543_v40, %v395_v28  ;;  %v3351_v28 = vld [vmem:[%s4574_s1 + $0x500] ss:$8 sps:$4 sm:$0xff]  }
  0xa2   : > { %2584 = vmatprep.subr.bf16.mxu1 %v3329_v56  ;;  %v306_v56 = vmax.f32 %v180_v44, 0.0  ;;  %v531_v6 = vadd.f32 %v530_v60, %v394_v47  ;;  %v568_v7 = vadd.f32 %v567_v62, %v361_v51  ;;  %v3366_v44 = vld [vmem:[%s4574_s1 + $0x4d0] ss:$8 sps:$4 sm:$0xff]   ;;  %v3374_v47 = vld [vmem:[%s4574_s1 + $0x4c4] ss:$8 sps:$4 sm:$0xff]  }
  0xa3   : > { %2548 = vmatpush1.bf16.msra.mxu0 %v3336_v12  ;;  %v546_v0 = vadd.f32 %v545_v41, %v544_v54  ;;  %v270_v12 = vld [vmem:[%s3707_s30 + $0x320] sm:$0xff]  ;;  %v3371_v54 = vld [vmem:[%s4574_s1 + $0x5d4] ss:$8 sps:$4 sm:$0xff]  }
  0xa4   : > { %2549 = vmatprep.subr.bf16.mxu0 %v3344_v21  ;;  %v553_v10 = vadd.f32 %v324_v57, %v306_v56  ;;  %v533_v14 = vadd.f32 %v532_v1, %v531_v6  ;;  %v569_v15 = vadd.f32 %v568_v7, %v379_v61  ;;  %v414_v21 = vmax.f32 %v288_v8, 0.0  ;;  %v3372_v55 = vld [vmem:[%s4574_s1 + $0x4c0] ss:$8 sps:$4 sm:$0xff]   ;;  %v3380_v57 = vld [vmem:[%s4574_s1 + $0x4b4] ss:$8 sps:$4 sm:$0xff]  }
  0xa5   : > { %2585 = vmatpush1.bf16.msra.mxu1 %v3327_v4  ;;  %v252_v4 = vld [vmem:[%s3707_s30 + $0x290] sm:$0xff]  ;;  %v396_v25 = vmax.f32 %v270_v12, 0.0  ;;  %v3377_v60 = vld [vmem:[%s4574_s1 + $0x5c4] ss:$8 sps:$4 sm:$0xff]   ;;  %v3375_v3 = vld [vmem:[%s4574_s1 + $0x5c0] ss:$8 sps:$4 sm:$0xff]  }
  0xa6   : > { %2586 = vmatprep.subr.bf16.mxu1 %v3335_v11  ;;  %v547_v11 = vrot.slane %v546_v0, 4  ;;  %v378_v16 = vmax.f32 %v252_v4, 0.0  ;;  %v554_v17 = vadd.f32 %v553_v10, %v342_v63  ;;  %v570_v24 = vadd.f32 %v569_v15, %v397_v2  ;;  %v3386_v1 = vld [vmem:[%s4574_s1 + $0x4a4] ss:$8 sps:$4 sm:$0xff]   ;;  %v3384_v7 = vld [vmem:[%s4574_s1 + $0x4a0] ss:$8 sps:$4 sm:$0xff]  }
  0xa7   : > { %2550 = vmatpush1.bf16.msra.mxu0 %v3342_v27  ;;  %v534_v29 = vrot.slane %v533_v14, 4  ;;  %v3383_v8 = vld [vmem:[%s4574_s1 + $0x5b4] ss:$8 sps:$4 sm:$0xff]   ;;  %v3381_v12 = vld [vmem:[%s4574_s1 + $0x5b0] ss:$8 sps:$4 sm:$0xff]  }
  0xa8   : > { %2551 = vmatprep.subr.bf16.mxu0 %v3350_v35  ;;  %v548_v19 = vadd.f32 %v547_v11, %v546_v0  ;;  %v572_v30 = vadd.f32 %v571_v20, %v570_v24  ;;  %v3359_v35 = vld [vmem:[%s4574_s1 + $0x5f4] ss:$8 sps:$4 sm:$0xff]   ;;  %v3378_v0 = vld [vmem:[%s4574_s1 + $0x4b0] ss:$8 sps:$4 sm:$0xff]   ;;  %v3398_v15 = vld [vmem:[%s4574_s1 + $0x484] ss:$8 sps:$4 sm:$0xff]  }
  0xa9   : > { %2587 = vmatpush1.bf16.msra.mxu1 %v3333_v26  ;;  %v555_v26 = vadd.f32 %v554_v17, %v360_v9  ;;  %v535_v40 = vadd.f32 %v534_v29, %v533_v14  ;;  %v3392_v9 = vld [vmem:[%s4574_s1 + $0x494] ss:$8 sps:$4 sm:$0xff]   ;;  %v3389_v14 = vld [vmem:[%s4574_s1 + $0x5a4] ss:$8 sps:$4 sm:$0xff]   ;;  %v3393_v24 = vld [vmem:[%s4574_s1 + $0x590] ss:$8 sps:$4 sm:$0xff]  }
  0xaa   : > { %2588 = vmatprep.subr.bf16.mxu1 %v3341_v34  ;;  %v549_v27 = vrot.slane %v548_v19, 2  ;;  %v558_v34 = vsel %vm427_vm0, %v414_v21, 0.0  ;;  %v573_v37 = vrot.slane %v572_v30, 4  ;;  %v3395_v20 = vld [vmem:[%s4574_s1 + $0x594] ss:$8 sps:$4 sm:$0xff]  }
  0xab   : > { %2552 = vmatpush1.bf16.msra.mxu0 %v3348_v59  ;;  %v556_v31 = vadd.f32 %v555_v26, %v378_v16  ;;  %v536_v51 = vrot.slane %v535_v40, 2  ;;  %v3369_v59 = vld [vmem:[%s4574_s1 + $0x5d0] ss:$8 sps:$4 sm:$0xff]   ;;  %v3404_v21 = vld [vmem:[%s4574_s1 + $0x674] ss:$8 sps:$4 sm:$0xff]  }
  0xac   : > { %2553 = vmatprep.subr.bf16.mxu0 %v3356_v5  ;;  %v550_v33 = vadd.f32 %v549_v27, %v548_v19  ;;  %v574_v41 = vadd.f32 %v573_v37, %v572_v30  ;;  %v3396_v19 = vld [vmem:[%s4574_s1 + $0x480] ss:$8 sps:$4 sm:$0xff]   ;;  %v3401_v26 = vld [vmem:[%s4574_s1 + $0x584] ss:$8 sps:$4 sm:$0xff]  }
  0xad   : > { %2589 = vmatpush1.bf16.msra.mxu1 %v3339_v53  ;;  %v557_v38 = vadd.f32 %v556_v31, %v396_v25  ;;  %v537_v61 = vadd.f32 %v536_v51, %v535_v40  ;;  %v3402_v25 = vld [vmem:[%s4574_s1 + $0x670] ss:$8 sps:$4 sm:$0xff]   ;;  %v3410_v27 = vld [vmem:[%s4574_s1 + $0x664] ss:$8 sps:$4 sm:$0xff]   ;;  %v3399_v29 = vld [vmem:[%s4574_s1 + $0x580] ss:$8 sps:$4 sm:$0xff]  }
  0xae   : > { %2590 = vmatprep.subr.bf16.mxu1 %v3347_v58  ;;  %v551_v39 = vrot.slane %v550_v33, 1  ;;  %v575_v48 = vrot.slane %v574_v41, 2  ;;  %v3408_v30 = vld [vmem:[%s4574_s1 + $0x660] ss:$8 sps:$4 sm:$0xff]   ;;  %v3407_v31 = vld [vmem:[%s4574_s1 + $0x774] ss:$8 sps:$4 sm:$0xff]  }
  0xaf   : > { %2554 = vmatpush2.bf16.msra.mxu0 %v3354_v18  ;;  %v559_v42 = vadd.f32 %v558_v34, %v557_v38  ;;  %v538_v4 = vrot.slane %v537_v61, 1  ;;  %v3387_v18 = vld [vmem:[%s4574_s1 + $0x5a0] ss:$8 sps:$4 sm:$0xff]   ;;  %v3413_v38 = vld [vmem:[%s4574_s1 + $0x764] ss:$8 sps:$4 sm:$0xff]   ;;  %v237_v40 = vld [vmem:[%s3707_s30 + $0x218] sm:$0xff] }
  0xb0   : > { %2555 = vmatprep.subr.bf16.mxu0 %v3362_v23  ;;  %v552_v45 = vadd.f32 %v551_v39, %v550_v33  ;;  %v576_v52 = vadd.f32 %v575_v48, %v574_v41  ;;  %v3405_v33 = vld [vmem:[%s4574_s1 + $0x770] ss:$8 sps:$4 sm:$0xff]   ;;  %v183_v34 = vld [vmem:[%s3707_s30 + $0x68] sm:$0xff]  ;;  %v363_v48 = vmax.f32 %v237_v40, 0.0  ;;  %v218_v51 = vld [vmem:[%s3707_s30 + $0x180] sm:$0xff] }
  0xb1   : > { %2591 = vmatpush1.bf16.msra.mxu1 %v3345_v13  ;;  %v560_v53 = vrot.slane %v559_v42, 4  ;;  %v539_v10 = vadd.f32 %v538_v4, %v537_v61  ;;  %v3390_v13 = vld [vmem:[%s4574_s1 + $0x490] ss:$8 sps:$4 sm:$0xff]   ;;  %v309_v41 = vmax.f32 %v183_v34, 0.0  ;;  %v203_v4 = vld [vmem:[%s3707_s30 + $0x108] sm:$0xff]  ;;  %v238_v40 = vld [vmem:[%s3707_s30 + $0x220] sm:$0xff] }
  0xb2   : > { %2592 = vmatprep.subr.bf16.mxu1 %v3353_v22  ;;  %v675_v49 = vmul.f32 0.020408163, %v552_v45  ;;  %v577_v58 = vrot.slane %v576_v52, 1  ;;  %v3414_v39 = vld [vmem:[%s4574_s1 + $0x650] ss:$8 sps:$4 sm:$0xff]  }
  0xb3   : > { %2556 = vmatpush2.bf16.msra.mxu0 %v3360_v32  ;;  %v561_v63 = vadd.f32 %v560_v53, %v559_v42  ;;  %v674_v16 = vmul.f32 0.020408163, %v539_v10  ;;  %v3416_v32 = vld [vmem:[%s4574_s1 + $0x654] ss:$8 sps:$4 sm:$0xff]   ;;  %v291_v45 = vld [vmem:[%s3707_s30 + $0x3c8] sm:$0x1] }
  0xb4   : > { %2557 = vmatprep.subr.bf16.mxu0 %v3368_v36  ;;  %v693_v56 = vpack.c.bf16 %v675_v49, %v675_v49  ;;  %v578_v62 = vadd.f32 %v577_v58, %v576_v52  ;;  %v219_v36 = vld [vmem:[%s3707_s30 + $0x188] sm:$0xff]  ;;  %v236_v61 = vld [vmem:[%s3707_s30 + $0x210] sm:$0xff] }
  0xb5   : > { %2593 = vmatpush1.bf16.msra.mxu1 %v3351_v28  ;;  %v562_v6 = vrot.slane %v561_v63, 2  ;;  %v692_v22 = vpack.c.bf16 %v674_v16, %v674_v16  ;;  %v3411_v53 = vld [vmem:[%s4574_s1 + $0x760] ss:$8 sps:$4 sm:$0xff]  }
  0xb6   : > { %2594 = vmatprep.subr.bf16.mxu1 %v3359_v35  ;;  %2569 = vmatprep.mubr.bf16.mxu0 %v693_v56  ;;  %v677_v2 = vmul.f32 0.020408163, %v578_v62  ;;  %v201_v35 = vld [vmem:[%s3707_s30 + $0xf8] sm:$0xff]  ;;  %v344_v56 = vmax.f32 %v218_v51, 0.0  ;;  %v3420_v62 = vld [vmem:[%s4574_s1 + $0x640] ss:$8 sps:$4 sm:$0xff]  }
  0xb7   : > { %2558 = vmatpush2.bf16.msra.mxu0 %v3366_v44  ;;  %v563_v11 = vadd.f32 %v562_v6, %v561_v63  ;;  %v327_v42 = vmax.f32 %v201_v35, 0.0  ;;  %v255_v44 = vld [vmem:[%s3707_s30 + $0x2a8] sm:$0xff]  ;;  %v364_v51 = vmax.f32 %v238_v40, 0.0 }
  0xb8   : > { %2559 = vmatprep.subr.bf16.mxu0 %v3374_v47  ;;  %v695_v5 = vpack.c.bf16 %v677_v2, %v677_v2  ;;  %v3422_v47 = vld [vmem:[%s4574_s1 + $0x644] ss:$8 sps:$4 sm:$0xff]   ;;  %v381_v58 = vmax.f32 %v255_v44, 0.0 }
  0xb9   : > { %2595 = vmatpush2.bf16.msra.mxu1 %v3357_v43  ;;  %v564_v17 = vrot.slane %v563_v11, 1  ;;  %v345_v43 = vmax.f32 %v219_v36, 0.0  ;;  %v592_v49 = vadd.f32 %v327_v42, %v309_v41  ;;  %v3432_v41 = vld [vmem:[%s4574_s1 + $0x620] ss:$8 sps:$4 sm:$0xff]  }
  0xba   : > { %2596 = vmatprep.subr.bf16.mxu1 %v3365_v46  ;;  %2610 = vmatprep.mubr.bf16.mxu1 %v695_v5  ;;  %v182_v46 = vld [vmem:[%s3707_s30 + $0x60] sm:$0xff]  ;;  %v221_v5 = vld [vmem:[%s3707_s30 + $0x198] sm:$0xff] }
  0xbb   : > { %2560 = vmatpush2.bf16.msra.mxu0 %v3372_v55  ;;  %v565_v23 = vadd.f32 %v564_v17, %v563_v11  ;;  %v308_v52 = vmax.f32 %v182_v46, 0.0  ;;  %v239_v11 = vld [vmem:[%s3707_s30 + $0x228] sm:$0xff]  ;;  %v290_v42 = vld [vmem:[%s3707_s30 + $0x3c0] sm:$0x1]  ;;  %v3440_v46 = vld [vmem:[%s4574_s1 + $0x614] ss:$8 sps:$4 sm:$0xff]  }
  0xbc   : > { %2561 = vmatprep.subr.bf16.mxu0 %v3380_v57  ;;  %v3419_v57 = vld [vmem:[%s4574_s1 + $0x754] ss:$8 sps:$4 sm:$0xff]  }
  0xbd   : > { %2597 = vmatpush2.bf16.msra.mxu1 %v3363_v50  ;;  %v676_v28 = vmul.f32 0.020408163, %v565_v23  ;;  %v200_v50 = vld [vmem:[%s3707_s30 + $0xf0] sm:$0xff]  ;;  %v202_v23 = vld [vmem:[%s3707_s30 + $0x100] sm:$0xff] }
  0xbe   : > { %2598 = vmatprep.subr.bf16.mxu1 %v3371_v54  ;;  %v273_v54 = vld [vmem:[%s3707_s30 + $0x338] sm:$0xff]  ;;  %v326_v55 = vmax.f32 %v200_v50, 0.0 }
  0xbf   : > { %2562 = vmatpush2.bf16.msra.mxu0 %v3378_v0  ;;  %v694_v37 = vpack.c.bf16 %v676_v28, %v676_v28  ;;  %v185_v0 = vld [vmem:[%s3707_s30 + $0x78] sm:$0xff]  ;;  %v399_v2 = vmax.f32 %v273_v54, 0.0 }
  0xc0   : > { %2563 = vmatprep.subr.bf16.mxu0 %v3386_v1  ;;  %v579_v63 = vadd.f32 %v326_v55, %v308_v52  ;;  %v3428_v1 = vld [vmem:[%s4574_s1 + $0x634] ss:$8 sps:$4 sm:$0xff]   ;;  %v311_v6 = vmax.f32 %v185_v0, 0.0  ;;  %v416_v55 = vmax.f32 %v290_v42, 0.0 }
  0xc1   : > { %2599 = vmatpush2.bf16.msra.mxu1 %v3369_v59  ;;  %v417_v59 = vmax.f32 %v291_v45, 0.0 }
  0xc2   : > { %2600 = vmatprep.subr.bf16.mxu1 %v3377_v60  ;;  %v593_v60 = vadd.f32 %v592_v49, %v345_v43  ;;  %v580_v10 = vadd.f32 %v579_v63, %v344_v56  ;;  %v3435_v63 = vld [vmem:[%s4574_s1 + $0x720] ss:$8 sps:$4 sm:$0xff]  }
  0xc3   : > { %2564 = vmatpush2.bf16.msra.mxu0 %v3384_v7  ;;  %v3417_v7 = vld [vmem:[%s4574_s1 + $0x750] ss:$8 sps:$4 sm:$0xff]   ;;  %v597_v17 = vsel %vm427_vm0, %v417_v59, 0.0 }
  0xc4   : > { %2565 = vmatprep.subr.bf16.mxu0 %v3392_v9  ;;  %v362_v9 = vmax.f32 %v236_v61, 0.0  ;;  %v3438_v59 = vld [vmem:[%s4574_s1 + $0x610] ss:$8 sps:$4 sm:$0xff]   ;;  %v3446_v61 = vld [vmem:[%s4574_s1 + $0x604] ss:$8 sps:$4 sm:$0xff]  }
  0xc5   : > { %2601 = vmatpush2.bf16.msra.mxu1 %v3375_v3  ;;  %v594_v3 = vadd.f32 %v593_v60, %v363_v48 }
  0xc6   : > { %2602 = vmatprep.subr.bf16.mxu1 %v3383_v8  ;;  %v254_v8 = vld [vmem:[%s3707_s30 + $0x2a0] sm:$0xff] }
  0xc7   : > { %2566 = vmatpush2.bf16.msra.mxu0 %v3390_v13  ;;  %v347_v13 = vmax.f32 %v221_v5, 0.0  ;;  %v595_v16 = vadd.f32 %v594_v3, %v381_v58  ;;  %v380_v28 = vmax.f32 %v254_v8, 0.0  ;;  %v3437_v58 = vld [vmem:[%s4574_s1 + $0x724] ss:$8 sps:$4 sm:$0xff]   ;;  %v3444_v8 = vld [vmem:[%s4574_s1 + $0x600] ss:$8 sps:$4 sm:$0xff]  }
  0xc8   : > { %2567 = vmatprep.subr.bf16.mxu0 %v3398_v15  ;;  %v3426_v15 = vld [vmem:[%s4574_s1 + $0x630] ss:$8 sps:$4 sm:$0xff]  }
  0xc9   : > { %2603 = vmatpush2.bf16.msra.mxu1 %v3381_v12  ;;  %v329_v12 = vmax.f32 %v203_v4, 0.0  ;;  %v3443_v4 = vld [vmem:[%s4574_s1 + $0x714] ss:$8 sps:$4 sm:$0xff]  }
  0xca   : > { %2604 = vmatprep.subr.bf16.mxu1 %v3389_v14  ;;  %v3425_v14 = vld [vmem:[%s4574_s1 + $0x744] ss:$8 sps:$4 sm:$0xff]  }
  0xcb   : > { %2568 = vmatpush2.bf16.msra.mxu0 %v3396_v19  ;;  %v184_v19 = vld [vmem:[%s3707_s30 + $0x70] sm:$0xff] }
  0xcc   : > { %2619 = vmatprep.subr.bf16.mxu0 %v3404_v21  ;;  %v365_v21 = vmax.f32 %v239_v11, 0.0 }
  0xcd   : > { %2605 = vmatpush2.bf16.msra.mxu1 %v3387_v18  ;;  %v257_v18 = vld [vmem:[%s3707_s30 + $0x2b8] sm:$0xff] }
  0xce   : > { %2606 = vmatprep.subr.bf16.mxu1 %v3395_v20  ;;  %2570 = vmatmul.mubr.bf16.vlgmr.msra.gmra.mxu0 %v692_v22  ;;  %v293_v20 = vld [vmem:[%s3707_s30 + $0x3d8] sm:$0x1]  ;;  %v618_v22 = vadd.f32 %v329_v12, %v311_v6  ;;  %v383_v34 = vmax.f32 %v257_v18, 0.0  ;;  %v584_v6 = vsel %vm427_vm0, %v416_v55, 0.0  ;;  %v292_v12 = vld [vmem:[%s3707_s30 + $0x3d0] sm:$0x1] }
  0xcf   : > { %2620 = vmatpush1.bf16.msra.mxu0 %v3402_v25  ;;  %v310_v25 = vmax.f32 %v184_v19, 0.0  ;;  %v187_v18 = vld [vmem:[%s3707_s30 + $0x88] sm:$0xff]  ;;  %v205_v19 = vld [vmem:[%s3707_s30 + $0x118] sm:$0xff] }
  0xd0   : > { %2621 = vmatprep.subr.bf16.mxu0 %v3410_v27  ;;  %v596_v27 = vadd.f32 %v595_v16, %v399_v2  ;;  %v619_v35 = vadd.f32 %v618_v22, %v347_v13  ;;  %v3441_v13 = vld [vmem:[%s4574_s1 + $0x710] ss:$8 sps:$4 sm:$0xff]   ;;  %v223_v22 = vld [vmem:[%s3707_s30 + $0x1a8] sm:$0xff] }
  0xd1   : > { %2607 = vmatpush2.bf16.msra.mxu1 %v3393_v24  ;;  %v220_v24 = vld [vmem:[%s3707_s30 + $0x190] sm:$0xff] }
  0xd2   : > { %2608 = vmatprep.subr.bf16.mxu1 %v3401_v26  ;;  %v3434_v26 = vld [vmem:[%s4574_s1 + $0x624] ss:$8 sps:$4 sm:$0xff]   ;;  %v346_v36 = vmax.f32 %v220_v24, 0.0  ;;  %v620_v44 = vadd.f32 %v619_v35, %v365_v21  ;;  %v313_v24 = vmax.f32 %v187_v18, 0.0 }
  0xd3   : > { %2622 = vmatpush1.bf16.msra.mxu0 %v3408_v30  ;;  %v328_v30 = vmax.f32 %v202_v23, 0.0  ;;  %v241_v23 = vld [vmem:[%s3707_s30 + $0x238] sm:$0xff] }
  0xd4   : > { %2623 = vmatprep.subr.bf16.mxu0 %v3416_v32  ;;  %v272_v32 = vld [vmem:[%s3707_s30 + $0x330] sm:$0xff]  ;;  %v621_v50 = vadd.f32 %v620_v44, %v383_v34  ;;  %v3447_v34 = vld [vmem:[%s4574_s1 + $0x700] ss:$8 sps:$4 sm:$0xff]   ;;  %v645_v42 = vsel %vm644_vm1, %v313_v24, 0.0  ;;  %v3482_v24 = vld [vmem:[%s4574_s1 + $0x6a4] ss:$8 sps:$4 sm:$0xff]  }
  0xd5   : > { %2609 = vmatpush2.bf16.msra.mxu1 %v3399_v29  ;;  %v275_v29 = vld [vmem:[%s3707_s30 + $0x348] sm:$0xff]  ;;  %v605_v45 = vadd.f32 %v328_v30, %v310_v25  ;;  %v398_v48 = vmax.f32 %v272_v32, 0.0  ;;  %v331_v25 = vmax.f32 %v205_v19, 0.0  ;;  %v349_v32 = vmax.f32 %v223_v22, 0.0  ;;  %v3465_v19 = vld [vmem:[%s4574_s1 + $0x7d0] ss:$8 sps:$4 sm:$0xff]  }
  0xd6   : > { %2660 = vmatprep.subr.bf16.mxu1 %v3407_v31  ;;  %v3423_v31 = vld [vmem:[%s4574_s1 + $0x740] ss:$8 sps:$4 sm:$0xff]   ;;  %v401_v43 = vmax.f32 %v275_v29, 0.0  ;;  %v3458_v30 = vld [vmem:[%s4574_s1 + $0x6e4] ss:$8 sps:$4 sm:$0xff]  }
  0xd7   : > { %2624 = vmatpush1.bf16.msra.mxu0 %v3414_v39  ;;  %v419_v39 = vmax.f32 %v293_v20, 0.0  ;;  %v606_v52 = vadd.f32 %v605_v45, %v346_v36  ;;  %v3449_v20 = vld [vmem:[%s4574_s1 + $0x704] ss:$8 sps:$4 sm:$0xff]   ;;  %v3456_v44 = vld [vmem:[%s4574_s1 + $0x6e0] ss:$8 sps:$4 sm:$0xff]  }
  0xd8   : > { %2611 = vmatmul.mubr.bf16.vlgmr.msra.gmra.mxu1 %v694_v37  ;;  %2625 = vmatprep.subr.bf16.mxu0 %v3422_v47  ;;  %v3431_v37 = vld [vmem:[%s4574_s1 + $0x734] ss:$8 sps:$4 sm:$0xff]   ;;  %v622_v60 = vadd.f32 %v621_v50, %v401_v43  ;;  %v259_v29 = vld [vmem:[%s3707_s30 + $0x2c8] sm:$0xff]  ;;  %v646_v43 = vsel %vm644_vm1, %v331_v25, 0.0  ;;  %v222_v22 = vld [vmem:[%s3707_s30 + $0x1a0] sm:$0xff] }
  0xd9   : > { %2661 = vmatpush1.bf16.msra.mxu1 %v3405_v33  ;;  %v581_v33 = vadd.f32 %v580_v10, %v362_v9  ;;  %v623_v56 = vsel %vm427_vm0, %v419_v39, 0.0  ;;  %v607_v3 = vadd.f32 %v606_v52, %v364_v51  ;;  %v3452_v10 = vld [vmem:[%s4574_s1 + $0x6f4] ss:$8 sps:$4 sm:$0xff]   ;;  %v648_v51 = vsel %vm644_vm1, %v349_v32, 0.0 }
  0xda   : > { %2662 = vmatprep.subr.bf16.mxu1 %v3413_v38  ;;  %v598_v38 = vadd.f32 %v597_v17, %v596_v27  ;;  %v3455_v39 = vld [vmem:[%s4574_s1 + $0x7f4] ss:$8 sps:$4 sm:$0xff]  }
  0xdb   : > { %2626 = vmatpush1.bf16.msra.mxu0 %v3420_v62  ;;  %v582_v49 = vadd.f32 %v581_v33, %v380_v28  ;;  %v418_v28 = vmax.f32 %v292_v12, 0.0  ;;  %v367_v33 = vmax.f32 %v241_v23, 0.0  ;;  %v3467_v12 = vld [vmem:[%s4574_s1 + $0x7d4] ss:$8 sps:$4 sm:$0xff]   ;;  %v3473_v23 = vld [vmem:[%s4574_s1 + $0x7c4] ss:$8 sps:$4 sm:$0xff]  }
  0xdc   : > { %2627 = vmatprep.subr.bf16.mxu0 %v3428_v1  ;;  %v599_v47 = vrot.slane %v598_v38, 4  ;;  %v624_v1 = vadd.f32 %v623_v56, %v622_v60  ;;  %v3462_v60 = vld [vmem:[%s4574_s1 + $0x6d0] ss:$8 sps:$4 sm:$0xff]  }
  0xdd   : > { %2663 = vmatpush1.bf16.msra.mxu1 %v3411_v53  ;;  %v3429_v53 = vld [vmem:[%s4574_s1 + $0x730] ss:$8 sps:$4 sm:$0xff]   ;;  %v583_v0 = vadd.f32 %v582_v49, %v398_v48  ;;  %v647_v48 = vadd.f32 %v646_v43, %v645_v42  ;;  %v3464_v49 = vld [vmem:[%s4574_s1 + $0x6d4] ss:$8 sps:$4 sm:$0xff]   ;;  %v650_v52 = vsel %vm644_vm1, %v367_v33, 0.0  ;;  %v2360_v43 = vlaneseq }
  0xde   : > { %2664 = vmatprep.subr.bf16.mxu1 %v3419_v57  ;;  %v600_v54 = vadd.f32 %v599_v47, %v598_v38  ;;  %v256_v57 = vld [vmem:[%s3707_s30 + $0x2b0] sm:$0xff]  ;;  %v625_v9 = vrot.slane %v624_v1, 4  ;;  %v277_v38 = vld [vmem:[%s3707_s30 + $0x358] sm:$0xff]  ;;  %v295_v47 = vld [vmem:[%s3707_s30 + $0x3e8] sm:$0x1] }
  0xdf   : > { %2628 = vmatpush1.bf16.msra.mxu0 %v3426_v15  ;;  %v382_v2 = vmax.f32 %v256_v57, 0.0  ;;  %v403_v50 = vmax.f32 %v277_v38, 0.0  ;;  %v421_v57 = vmax.f32 %v295_v47, 0.0  ;;  %v240_v33 = vld [vmem:[%s3707_s30 + $0x230] sm:$0xff]  ;;  %v3494_v47 = vld [vmem:[%s4574_s1 + $0x684] ss:$8 sps:$4 sm:$0xff]  }
  0xe0   : > { %2629 = vmatprep.subr.bf16.mxu0 %v3434_v26  ;;  %v601_v62 = vrot.slane %v600_v54, 2  ;;  %v626_v15 = vadd.f32 %v625_v9, %v624_v1  ;;  %v3450_v26 = vld [vmem:[%s4574_s1 + $0x6f0] ss:$8 sps:$4 sm:$0xff]   ;;  %vm2762_vm3 = vcmp.lt.s32.totalorder %v2360_v43, 256 }
  0xe1   : > { %2665 = vmatpush1.bf16.msra.mxu1 %v3417_v7  ;;  %v274_v7 = vld [vmem:[%s3707_s30 + $0x340] sm:$0xff]  ;;  %v608_v17 = vadd.f32 %v607_v3, %v382_v2  ;;  %v654_v1 = vsel %vm644_vm1, %v403_v50, 0.0  ;;  %v3486_v42 = vld [vmem:[%s4574_s1 + $0x690] ss:$8 sps:$4 sm:$0xff]  }
  0xe2   : > { %2666 = vmatprep.subr.bf16.mxu1 %v3425_v14  ;;  %v602_v5 = vadd.f32 %v601_v62, %v600_v54  ;;  %v585_v14 = vadd.f32 %v584_v6, %v583_v0  ;;  %v400_v16 = vmax.f32 %v274_v7, 0.0  ;;  %v627_v27 = vrot.slane %v626_v15, 2  ;;  %v3470_v0 = vld [vmem:[%s4574_s1 + $0x6c4] ss:$8 sps:$4 sm:$0xff]  }
  0xe3   : > { %2630 = vmatpush1.bf16.msra.mxu0 %v3432_v41  ;;  %v385_v41 = vmax.f32 %v259_v29, 0.0  ;;  %v649_v54 = vadd.f32 %v648_v51, %v647_v48  ;;  %v657_v7 = vsel %vm656_vm2, %v421_v57, 0.0  ;;  %v3491_v57 = vld [vmem:[%s4574_s1 + $0x794] ss:$8 sps:$4 sm:$0xff]  }
  0xe4   : > { %2631 = vmatprep.subr.bf16.mxu0 %v3440_v46  ;;  %v603_v11 = vrot.slane %v602_v5, 1  ;;  %v586_v35 = vrot.slane %v585_v14, 4  ;;  %v628_v36 = vadd.f32 %v627_v27, %v626_v15  ;;  %v610_v46 = vsel %vm427_vm0, %v418_v28, 0.0 }
  0xe5   : > { %2667 = vmatpush1.bf16.msra.mxu1 %v3423_v31  ;;  %v651_v62 = vadd.f32 %v650_v52, %v649_v54  ;;  %v348_v28 = vmax.f32 %v222_v22, 0.0  ;;  %v3492_v54 = vld [vmem:[%s4574_s1 + $0x680] ss:$8 sps:$4 sm:$0xff]  }
  0xe6   : > { %2668 = vmatprep.subr.bf16.mxu1 %v3431_v37  ;;  %v604_v21 = vadd.f32 %v603_v11, %v602_v5  ;;  %v609_v37 = vadd.f32 %v608_v17, %v400_v16  ;;  %v629_v45 = vrot.slane %v628_v36, 1  ;;  %v587_v55 = vadd.f32 %v586_v35, %v585_v14  ;;  %v204_v11 = vld [vmem:[%s3707_s30 + $0x110] sm:$0xff] }
  0xe7   : > { %2632 = vmatpush1.bf16.msra.mxu0 %v3438_v59  ;;  %v3453_v59 = vld [vmem:[%s4574_s1 + $0x7f0] ss:$8 sps:$4 sm:$0xff]   ;;  %v330_v18 = vmax.f32 %v204_v11, 0.0  ;;  %v3488_v35 = vld [vmem:[%s4574_s1 + $0x694] ss:$8 sps:$4 sm:$0xff]  }
  0xe8   : > { %2633 = vmatprep.subr.bf16.mxu0 %v3446_v61  ;;  %v679_v31 = vmul.f32 0.020408163, %v604_v21  ;;  %v611_v56 = vadd.f32 %v610_v46, %v609_v37  ;;  %v588_v5 = vrot.slane %v587_v55, 2  ;;  %v3485_v46 = vld [vmem:[%s4574_s1 + $0x7a4] ss:$8 sps:$4 sm:$0xff]  }
  0xe9   : > { %2669 = vmatpush1.bf16.msra.mxu1 %v3429_v53  ;;  %v630_v53 = vadd.f32 %v629_v45, %v628_v36  ;;  %v258_v45 = vld [vmem:[%s3707_s30 + $0x2c0] sm:$0xff] }
  0xea   : > { %2670 = vmatprep.subr.bf16.mxu1 %v3437_v58  ;;  %v697_v40 = vpack.c.bf16 %v679_v31, %v679_v31  ;;  %v652_v58 = vsel %vm644_vm1, %v385_v41, 0.0  ;;  %v612_v6 = vrot.slane %v611_v56, 4  ;;  %v589_v15 = vadd.f32 %v588_v5, %v587_v55  ;;  %v3480_v31 = vld [vmem:[%s4574_s1 + $0x6a0] ss:$8 sps:$4 sm:$0xff]   ;;  %v3477_v41 = vld [vmem:[%s4574_s1 + $0x7b0] ss:$8 sps:$4 sm:$0xff]  }
  0xeb   : > { %2634 = vmatpush1.bf16.msra.mxu0 %v3444_v8  ;;  %v681_v61 = vmul.f32 0.020408163, %v630_v53  ;;  %v653_v3 = vadd.f32 %v652_v58, %v651_v62  ;;  %v3468_v8 = vld [vmem:[%s4574_s1 + $0x6c0] ss:$8 sps:$4 sm:$0xff]   ;;  %v384_v51 = vmax.f32 %v258_v45, 0.0  ;;  %v4481_v55 = vshrl.u32 %v2360_v43, 7 }
  0xec   : > { %2635 = vmatprep.subr.bf16.mxu0 %v3452_v10  ;;  %2651 = vmatprep.mubr.bf16.mxu0 %v697_v40  ;;  %v186_v10 = vld [vmem:[%s3707_s30 + $0x80] sm:$0xff]  ;;  %v613_v16 = vadd.f32 %v612_v6, %v611_v56  ;;  %v276_v56 = vld [vmem:[%s3707_s30 + $0x350] sm:$0xff] }
  0xed   : > { %2671 = vmatpush1.bf16.msra.mxu1 %v3435_v63  ;;  %v3461_v63 = vld [vmem:[%s4574_s1 + $0x7e4] ss:$8 sps:$4 sm:$0xff]   ;;  %v699_v2 = vpack.c.bf16 %v681_v61, %v681_v61  ;;  %v655_v9 = vadd.f32 %v654_v1, %v653_v3  ;;  %v312_v17 = vmax.f32 %v186_v10, 0.0  ;;  %v3483_v53 = vld [vmem:[%s4574_s1 + $0x7a0] ss:$8 sps:$4 sm:$0xff]  }
  0xee   : > { %2672 = vmatprep.subr.bf16.mxu1 %v3443_v4  ;;  %v3459_v4 = vld [vmem:[%s4574_s1 + $0x7e0] ss:$8 sps:$4 sm:$0xff]   ;;  %v614_v27 = vrot.slane %v613_v16, 2  ;;  %v3500_v58 = vld [vmem:[%s4574_s1 + $0x874] ss:$8 sps:$4 sm:$0xff]  }
  0xef   : > { %2636 = vmatpush2.bf16.msra.mxu0 %v3450_v26  ;;  %2692 = vmatprep.mubr.bf16.mxu1 %v699_v2  ;;  %v658_v14 = vadd.f32 %v657_v7, %v655_v9  ;;  %v590_v26 = vrot.slane %v589_v15, 1  ;;  %v631_v29 = vadd.f32 %v330_v18, %v312_v17  ;;  %v3489_v1 = vld [vmem:[%s4574_s1 + $0x790] ss:$8 sps:$4 sm:$0xff]   ;;  %v2362_v2 = vsub.s32 0, %v4481_v55  ;;  %v3497_v5 = vld [vmem:[%s4574_s1 + $0x784] ss:$8 sps:$4 sm:$0xff]  }
  0xf0   : > { %2637 = vmatprep.subr.bf16.mxu0 %v3458_v30  ;;  %v3471_v30 = vld [vmem:[%s4574_s1 + $0x7c0] ss:$8 sps:$4 sm:$0xff]   ;;  %v615_v38 = vadd.f32 %v614_v27, %v613_v16  ;;  %v3498_v3 = vld [vmem:[%s4574_s1 + $0x870] ss:$8 sps:$4 sm:$0xff]   ;;  %v3503_v7 = vld [vmem:[%s4574_s1 + $0x864] ss:$8 sps:$4 sm:$0xff]  }
  0xf1   : > { %2673 = vmatpush1.bf16.msra.mxu1 %v3441_v13  ;;  %v3476_v13 = vld [vmem:[%s4574_s1 + $0x6b4] ss:$8 sps:$4 sm:$0xff]   ;;  %v659_v21 = vrot.slane %v658_v14, 4  ;;  %v591_v37 = vadd.f32 %v590_v26, %v589_v15  ;;  %v632_v40 = vadd.f32 %v631_v29, %v348_v28  ;;  %v978_v6 = vld [vmem:[%s4575_s2] sm:$0x3] }
  0xf2   : > { %2674 = vmatprep.subr.bf16.mxu1 %v3449_v20  ;;  %v3474_v20 = vld [vmem:[%s4574_s1 + $0x6b0] ss:$8 sps:$4 sm:$0xff]   ;;  %v616_v50 = vrot.slane %v615_v38, 1  ;;  %v3501_v15 = vld [vmem:[%s4574_s1 + $0x860] ss:$8 sps:$4 sm:$0xff]  }
  0xf3   : > { %2638 = vmatpush2.bf16.msra.mxu0 %v3456_v44  ;;  %v660_v25 = vadd.f32 %v659_v21, %v658_v14  ;;  %v2363_v14 = vrot.slane %v978_v6, %v2362_v2  ;;  %v3506_v18 = vld [vmem:[%s4574_s1 + $0x854] ss:$8 sps:$4 sm:$0xff]   ;;  %v3509_v26 = vld [vmem:[%s4574_s1 + $0x844] ss:$8 sps:$4 sm:$0xff]   ;;  %v3516_v45 = vld [vmem:[%s4574_s1 + $0x810] ss:$8 sps:$4 sm:$0xff]  }
  0xf4   : > { %2639 = vmatprep.subr.bf16.mxu0 %v3464_v49  ;;  %v678_v49 = vmul.f32 0.020408163, %v591_v37  ;;  %v617_v62 = vadd.f32 %v616_v50, %v615_v38  ;;  %v3510_v37 = vld [vmem:[%s4574_s1 + $0x830] ss:$8 sps:$4 sm:$0xff]   ;;  %v3515_v38 = vld [vmem:[%s4574_s1 + $0x824] ss:$8 sps:$4 sm:$0xff]  }
  0xf5   : > { %2675 = vmatpush1.bf16.msra.mxu1 %v3447_v34  ;;  %v661_v32 = vrot.slane %v660_v25, 2  ;;  %v3479_v34 = vld [vmem:[%s4574_s1 + $0x7b4] ss:$8 sps:$4 sm:$0xff]  }
  0xf6   : > { %2676 = vmatprep.subr.bf16.mxu1 %v3455_v39  ;;  %v366_v39 = vmax.f32 %v240_v33, 0.0  ;;  %v696_v61 = vpack.c.bf16 %v678_v49, %v678_v49  ;;  %v680_v11 = vmul.f32 0.020408163, %v617_v62  ;;  %v3512_v33 = vld [vmem:[%s4574_s1 + $0x834] ss:$8 sps:$4 sm:$0xff]  }
  0xf7   : > { %2640 = vmatpush2.bf16.msra.mxu0 %v3462_v60  ;;  %v662_v36 = vadd.f32 %v661_v32, %v660_v25  ;;  %v3524_v49 = vld [vmem:[%s4574_s1 + $0x894] ss:$8 sps:$4 sm:$0xff]  }
  0xf8   : > { %2641 = vmatprep.subr.bf16.mxu0 %v3470_v0  ;;  %v633_v52 = vadd.f32 %v632_v40, %v366_v39 }
  0xf9   : > { %2677 = vmatpush2.bf16.msra.mxu1 %v3453_v59  ;;  %v663_v44 = vrot.slane %v662_v36, 1  ;;  %v294_v59 = vld [vmem:[%s3707_s30 + $0x3e0] sm:$0x1] }
  0xfa   : > { %2678 = vmatprep.subr.bf16.mxu1 %v3461_v63  ;;  %v402_v63 = vmax.f32 %v276_v56, 0.0  ;;  %v634_v0 = vadd.f32 %v633_v52, %v384_v51  ;;  %v3522_v51 = vld [vmem:[%s4574_s1 + $0x890] ss:$8 sps:$4 sm:$0xff]   ;;  %v3527_v52 = vld [vmem:[%s4574_s1 + $0x884] ss:$8 sps:$4 sm:$0xff]  }
  0xfb   : > { %2642 = vmatpush2.bf16.msra.mxu0 %v3468_v8  ;;  %v664_v48 = vadd.f32 %v663_v44, %v662_v36  ;;  %v2366_v8 = vsub.s32 1, %v4481_v55 }
  0xfc   : > { %2643 = vmatprep.subr.bf16.mxu0 %v3476_v13  ;;  %v3495_v13 = vld [vmem:[%s4574_s1 + $0x780] ss:$8 sps:$4 sm:$0xff]  }
  0xfd   : > { %2679 = vmatpush2.bf16.msra.mxu1 %v3459_v4  ;;  %v683_v60 = vmul.f32 0.020408163, %v664_v48  ;;  %v420_v4 = vmax.f32 %v294_v59, 0.0  ;;  %v3519_v48 = vld [vmem:[%s4574_s1 + $0x800] ss:$8 sps:$4 sm:$0xff]  }
  0xfe   : > { %2680 = vmatprep.subr.bf16.mxu1 %v3467_v12  ;;  %v635_v12 = vadd.f32 %v634_v0, %v402_v63 }
  0xff   : > { %2644 = vmatpush2.bf16.msra.mxu0 %v3474_v20  ;;  %v701_v9 = vpack.c.bf16 %v683_v60, %v683_v60  ;;  %v636_v16 = vsel %vm427_vm0, %v420_v4, 0.0  ;;  %v698_v20 = vpack.c.bf16 %v680_v11, %v680_v11 }
 0x100   : > { %2645 = vmatprep.subr.bf16.mxu0 %v3482_v24  ;;  %v637_v22 = vadd.f32 %v636_v16, %v635_v12  ;;  %v3504_v24 = vld [vmem:[%s4574_s1 + $0x850] ss:$8 sps:$4 sm:$0xff]  }
 0x101   : > { %2681 = vmatpush2.bf16.msra.mxu1 %v3465_v19  ;;  %v2367_v19 = vrot.slane %v978_v6, %v2366_v8 }
 0x102   : > { %2682 = vmatprep.subr.bf16.mxu1 %v3473_v23  ;;  %v638_v29 = vrot.slane %v637_v22, 4 }
 0x103   : > { %2646 = vmatpush2.bf16.msra.mxu0 %v3480_v31  ;;  %v3507_v31 = vld [vmem:[%s4574_s1 + $0x840] ss:$8 sps:$4 sm:$0xff]  }
 0x104   : > { %2647 = vmatprep.subr.bf16.mxu0 %v3488_v35  ;;  %v639_v36 = vadd.f32 %v638_v29, %v637_v22 }
 0x105   : > { %2683 = vmatpush2.bf16.msra.mxu1 %v3471_v30 }
 0x106   : > { %2684 = vmatprep.subr.bf16.mxu1 %v3479_v34  ;;  %v640_v40 = vrot.slane %v639_v36, 2 }
 0x107   : > { %2648 = vmatpush2.bf16.msra.mxu0 %v3486_v42  ;;  %v3518_v42 = vld [vmem:[%s4574_s1 + $0x814] ss:$8 sps:$4 sm:$0xff]  }
 0x108   : > { %2649 = vmatprep.subr.bf16.mxu0 %v3494_v47  ;;  %v641_v44 = vadd.f32 %v640_v40, %v639_v36 }
 0x109   : > { %2685 = vmatpush2.bf16.msra.mxu1 %v3477_v41  ;;  %v3513_v41 = vld [vmem:[%s4574_s1 + $0x820] ss:$8 sps:$4 sm:$0xff]  }
 0x10a   : > { %2686 = vmatprep.subr.bf16.mxu1 %v3485_v46  ;;  %v3521_v46 = vld [vmem:[%s4574_s1 + $0x804] ss:$8 sps:$4 sm:$0xff]   ;;  %v642_v47 = vrot.slane %v641_v44, 1 }
 0x10b   : > { %2650 = vmatpush2.bf16.msra.mxu0 %v3492_v54  ;;  %v3525_v54 = vld [vmem:[%s4574_s1 + $0x880] ss:$8 sps:$4 sm:$0xff]  }
 0x10c   : > { %2701 = vmatprep.subr.bf16.mxu0 %v3500_v58  ;;  %v643_v50 = vadd.f32 %v642_v47, %v641_v44 }
 0x10d   : > { %2687 = vmatpush2.bf16.msra.mxu1 %v3483_v53 }
 0x10e   : > { %2688 = vmatprep.subr.bf16.mxu1 %v3491_v57  ;;  %v2407_v10 = vpop.f32.mrf.mxu0  ;;  %2652 = vmatmul.mubr.bf16.vlgmr.msra.gmra.mxu0 %v696_v61  ;;  %v682_v53 = vmul.f32 0.020408163, %v643_v50 }
 0x10f   : > { %2702 = vmatpush1.bf16.msra.mxu0 %v3498_v3  ;;  %3101 = vmatprep.mubr.msk.bf16.mxu0 %vm644_vm1, %v701_v9  ;;  %v2408_v23 = vadd.f32 %v2407_v10, %v2363_v14 }
 0x110   : > { %v2409_v17 = vpop.f32.mrf.mxu0  ;;  %2703 = vmatprep.subr.bf16.mxu0 %v3503_v7  ;;  %v700_v56 = vpack.c.bf16 %v682_v53, %v682_v53 }
 0x111   : > { %2689 = vmatpush2.bf16.msra.mxu1 %v3489_v1  ;;  %v2410_v27 = vadd.f32 %v2409_v17, %v2367_v19 }
 0x112   : > { %2690 = vmatprep.subr.bf16.mxu1 %v3497_v5  ;;  %v2411_v21 = vpop.f32.mrf.mxu0 }
 0x113   : > { %2704 = vmatpush1.bf16.msra.mxu0 %v3501_v15 }
 0x114   : > { %v2412_v25 = vpop.f32.mrf.mxu0  ;;  %2705 = vmatprep.subr.bf16.mxu0 %v3506_v18 }
 0x115   : > { %2691 = vmatpush2.bf16.msra.mxu1 %v3495_v13  ;;  %v3536_v25 = vmov 1966171168  }
 0x117   : > { %2706 = vmatpush1.bf16.msra.mxu0 %v3504_v24 }
 0x118   : > { %v2448_v28 = vpop.f32.mrf.mxu1  ;;  %2693 = vmatmul.mubr.bf16.vlgmr.msra.gmra.mxu1 %v698_v20  ;;  %2707 = vmatprep.subr.bf16.mxu0 %v3509_v26  ;;  %v2746_v26 = vunpack.c.l.s4 %v3536_v25 }
 0x119   : > { %v2449_v30 = vadd.f32 %v2448_v28, %v2408_v23 }
 0x11a   : > { %v2450_v32 = vpop.f32.mrf.mxu1  ;;  %v2747_v29 = vunpack.c.0.s8 %v2746_v26 }
 0x11b   : > { %v2451_v34 = vadd.f32 %v2450_v32, %v2410_v27  ;;  %2708 = vmatpush1.bf16.msra.mxu0 %v3507_v31 }
 0x11c   : > { %v2452_v35 = vpop.f32.mrf.mxu1  ;;  %2709 = vmatprep.subr.bf16.mxu0 %v3512_v33  ;;  %v2750_v36 = vsub.s32 %v2747_v29, %v4481_v55 }
 0x11e   : > { %v2453_v39 = vpop.f32.mrf.mxu1 }
 0x11f   : > { %2710 = vmatpush1.bf16.msra.mxu0 %v3510_v37 }
 0x120   : > { %2711 = vmatprep.subr.bf16.mxu0 %v3515_v38 }
 0x123   : > { %2712 = vmatpush1.bf16.msra.mxu0 %v3513_v41 }
 0x124   : > { %2713 = vmatprep.subr.bf16.mxu0 %v3518_v42 }
 0x127   : > { %2714 = vmatpush1.bf16.msra.mxu0 %v3516_v45 }
 0x128   : > { %2715 = vmatprep.subr.bf16.mxu0 %v3521_v46 }
 0x12b   : > { %2716 = vmatpush1.bf16.msra.mxu0 %v3519_v48 }
 0x12c   : > { %2729 = vmatprep.subr.bf16.mxu0 %v3524_v49 }
 0x12f   : > { %2730 = vmatpush2.bf16.msra.mxu0 %v3522_v51 }
 0x130   : > { %2731 = vmatprep.subr.bf16.mxu0 %v3527_v52 }
 0x133   : > { %2732 = vmatpush2.bf16.msra.mxu0 %v3525_v54 }
 0x136   : > { %2734 = vmatmul.mubr.bf16.vlgmr.msra.gmra.mxu0 %v700_v56 }
 0x14e   : > { %v2489_v57 = vpop.f32.mrf.mxu0 }
 0x14f   : > { %v2490_v58 = vadd.f32 %v2489_v57, %v2449_v30 }
 0x150   : > { %v2491_v59 = vpop.f32.mrf.mxu0 }
 0x151   : > { %v2492_v60 = vadd.f32 %v2491_v59, %v2451_v34 }
 0x152   : > { %v2493_v61 = vpop.f32.mrf.mxu0 }
 0x154   : > { %v2494_v62 = vpop.f32.mrf.mxu0 }
 0x158   : > { %v2530_v63 = vpop.f32.mrf.mxu1 }
 0x159   : > { %v2531_v0 = vadd.f32 %v2530_v63, %v2490_v58 }
 0x15a   : > { %v2532_v1 = vpop.f32.mrf.mxu1 }
 0x15b   : > { %v2533_v2 = vadd.f32 %v2532_v1, %v2492_v60 }
 0x15c   : > { %v2534_v3 = vpop.f32.mrf.mxu1 }
 0x15e   : > { %v2535_v4 = vpop.f32.mrf.mxu1 }
 0x18e   : > { %v2571_v5 = vpop.f32.mrf.mxu0 }
 0x18f   : > { %v2572_v6 = vadd.f32 %v2571_v5, %v2531_v0 }
 0x190   : > { %v2573_v7 = vpop.f32.mrf.mxu0 }
 0x191   : > { %v2574_v8 = vadd.f32 %v2573_v7, %v2533_v2 }
 0x192   : > { %v2575_v9 = vpop.f32.mrf.mxu0 }
 0x194   : > { %v2576_v10 = vpop.f32.mrf.mxu0 }
 0x198   : > { %v2612_v11 = vpop.f32.mrf.mxu1 }
 0x199   : > { %v2613_v12 = vadd.f32 %v2612_v11, %v2572_v6 }
 0x19a   : > { %v2614_v13 = vpop.f32.mrf.mxu1 }
 0x19b   : > { %v2615_v14 = vadd.f32 %v2614_v13, %v2574_v8 }
 0x19c   : > { %v2616_v15 = vpop.f32.mrf.mxu1 }
 0x19e   : > { %v2617_v16 = vpop.f32.mrf.mxu1 }
 0x1ce   : > { %v2653_v17 = vpop.f32.mrf.mxu0 }
 0x1cf   : > { %v2654_v27 = vadd.f32 %v2653_v17, %v2613_v12 }
 0x1d0   : > { %v2655_v18 = vpop.f32.mrf.mxu0 }
 0x1d1   : > { %v2656_v28 = vadd.f32 %v2655_v18, %v2615_v14 }
 0x1d2   : > { %v2657_v19 = vpop.f32.mrf.mxu0 }
 0x1d4   : > { %v2658_v20 = vpop.f32.mrf.mxu0 }
 0x1d8   : > { %v2694_v21 = vpop.f32.mrf.mxu1 }
 0x1d9   : > { %v2695_v31 = vadd.f32 %v2694_v21, %v2654_v27 }
 0x1da   : > { %v2696_v22 = vpop.f32.mrf.mxu1 }
 0x1db   : > { %v2697_v32 = vadd.f32 %v2696_v22, %v2656_v28 }
 0x1dc   : > { %v2698_v23 = vpop.f32.mrf.mxu1 }
 0x1de   : > { %v2699_v24 = vpop.f32.mrf.mxu1 }
 0x1f6   : > { %v2735_v30 = vpop.f32.mrf.mxu0 }
 0x1f7   : > { %v2736_v34 = vadd.f32 %v2735_v30, %v2695_v31 }
 0x1f8   : > { %v2737_v33 = vpop.f32.mrf.mxu0 }
 0x1f9   : > { %v2738_v35 = vadd.f32 %v2737_v33, %v2697_v32 }
 0x1fa   : > { %v2739_v37 = vpop.f32.mrf.mxu0 }
 0x1fb   : > { %v2744_v38 = vcombine.low %v2736_v34, %v2738_v35 }
 0x1fc   : > { %v2740_v39 = vpop.f32.mrf.mxu0 }
 0x1fd   : > { %v2751_v40 = vrot.slane %v2744_v38, %v2750_v36 }
 0x1ff   : > { %v2758_v41 = vrot.slane %v2751_v40, %v2750_v36 }
 0x201   : > { %2764 = vst.msk [vmem:[%s168_s17] sm:$0x3] %vm2762_vm3, %v2758_v41 }
 0x202 PF: > { %s13_s12 = sadd.s32 1, %s3534_s12  }
 0x203   : > { %p10_p4 = scmp.ge.s32.totalorder %s13_s12, 4  }
 0x205   :  { %12 = sbr.rel (!%p10_p4) target bundleno = 1 (0x1), region = 62 }

</bundles_post_ra>
